<compile_context>
chip_gen: v7x
topology: tpu7x:2x2x1
jax: 0.10.0
libtpu: 0.0.40
codegen_flags: <defaults>
</compile_context>

<pallas_src>
import itertools
import math

import jax
import jax.numpy as jnp
from jax.experimental import pallas as pl
from jax.experimental.pallas import tpu as pltpu

PI = math.pi
SQRT2 = math.sqrt(2.0)

LANE = 128         # lanes per row (TPU vreg lane width)
CHUNK_ROWS = 32    # in-kernel accumulation chunk (multiple of 8 sublanes)


def _tpu_memory_plan():
    """Per-generation (tile rows, scoped VMEM limit).
    v5e/v6e have 128 MiB physical VMEM -> allow 64 MiB scoped; v7x only has 64 MiB
    (and unknown chips) -> cap at 48 MiB.  512-row tiles need ~17 MiB double-buffered
    per kernel, so both limits leave ample headroom."""
    try:
        cap = int(pltpu.get_tpu_info().vmem_capacity_bytes)
    except Exception:
        cap = 0
    if cap >= 100 * 1024 * 1024:
        return 512, 64 * 1024 * 1024
    return 512, 48 * 1024 * 1024


TARGET_ROWS, VMEM_LIMIT = _tpu_memory_plan()

# Mandel ordering: (00, 11, 22, 12, 02, 01), sqrt(2) weights on shear rows/cols.
MANDEL_PAIRS = ((0, 0), (1, 1), (2, 2), (1, 2), (0, 2), (0, 1))
MANDEL_W = (1.0, 1.0, 1.0, SQRT2, SQRT2, SQRT2)
_PAIR_IDX = {(0, 0): 0, (1, 1): 1, (2, 2): 2,
             (1, 2): 3, (2, 1): 3, (0, 2): 4, (2, 0): 4, (0, 1): 5, (1, 0): 5}

# Packed upper-triangle index table for a symmetric 6x6 operator (21 unique planes).
_TRI = [[0] * 6 for _ in range(6)]
_cnt = 0
for _i in range(6):
    for _j in range(_i, 6):
        _TRI[_i][_j] = _cnt
        _TRI[_j][_i] = _cnt
        _cnt += 1


def _delta(a, b):
    return 1.0 if a == b else 0.0


def C_3333_to_mandel(C):
    """(3,3,3,3,...) -> (6,6,...)."""
    rows = []
    for a, (i, j) in enumerate(MANDEL_PAIRS):
        cols = [MANDEL_W[a] * MANDEL_W[b] * C[i, j, k, l]
                for b, (k, l) in enumerate(MANDEL_PAIRS)]
        rows.append(jnp.stack(cols, 0))
    return jnp.stack(rows, 0)


def C_mandel_to_3333(M):
    """(6,6,...) -> (3,3,3,3,...) assuming minor symmetry."""
    out = jnp.zeros((3, 3, 3, 3) + M.shape[2:], dtype=M.dtype)
    for i, j, k, l in itertools.product(range(3), repeat=4):
        a = _PAIR_IDX[(i, j)]
        b = _PAIR_IDX[(k, l)]
        out = out.at[i, j, k, l].set(M[a, b] / (MANDEL_W[a] * MANDEL_W[b]))
    return out


# ---------------------------------------------------------------------------
# G_freq precompute (setup-time buffer, mirrors GreensOp._compute_coeffs).
# All terms are real (q real, coefficients real, Nyquist fill = real S_ref),
# so G is computed and stored as float32.
# ---------------------------------------------------------------------------
def get_freqs(N, willot=True):
    L = 1.0
    h = L / N
    s = 2.0 * PI / (h * N)
    q = jnp.fft.fftfreq(N, d=h).astype(jnp.float32)
    if N % 2 == 0:
        q = q.at[N // 2].multiply(-1.0)
    qv = jnp.stack(jnp.meshgrid(q, q, q, indexing="ij"), 0)
    if willot:
        phi = 0.5 * s * h * qv
        c = jnp.cos(phi)
        sn = jnp.sin(phi)
        qv = jnp.stack([sn[0] * c[1] * c[2],
                        c[0] * sn[1] * c[2],
                        c[0] * c[1] * sn[2]], 0)
    return qv


def get_G_entry(q, lamb_0, mu_0):
    coef_1 = 1.0 / (4.0 * mu_0)
    coef_2 = (lamb_0 + mu_0) / (mu_0 * (lamb_0 + 2.0 * mu_0))
    ret = jnp.zeros((3, 3, 3, 3) + q.shape[1:], dtype=jnp.float32)
    for i, j, k, h in itertools.product(range(3), repeat=4):
        t1 = (_delta(k, i) * q[h] * q[j] + _delta(h, i) * q[k] * q[j]
              + _delta(k, j) * q[h] * q[i] + _delta(h, j) * q[k] * q[i])
        t2 = q[i] * q[j] * q[k] * q[h]
        ret = ret.at[i, j, k, h].set(coef_1 * t1 - coef_2 * t2)
    return ret


def compute_G_freq(N, lamb_0, mu_0, S_ref, willot=True, validate=True):
    """Nyquist method = STRESS (module default). Returns real (6,6,N,N,N)."""
    q = get_freqs(N, willot=willot)
    normq = jnp.sqrt((q ** 2).sum(0, keepdims=True))
    normq = normq.at[:, 0, 0, 0].set(1.0)
    q = q / normq
    G = get_G_entry(q, lamb_0, mu_0)
    if N % 2 == 0:
        Nhalf = N // 2
        s_ref = C_mandel_to_3333(S_ref.astype(jnp.float32))[..., None, None]
        G = G.at[..., Nhalf, :, :].set(s_ref)
        G = G.at[..., :, Nhalf, :].set(s_ref)
        G = G.at[..., :, :, Nhalf].set(s_ref)
    G = G.at[..., 0, 0, 0].set(0.0)
    G_sym = C_3333_to_mandel(G)
    if validate:  # setup-time only; do not call under jit (forces a host sync)
        G_back = C_mandel_to_3333(G_sym)
        assert bool(jnp.allclose(G, G_back, atol=1e-5)), "Mandel round-trip failed"
    return G_sym  # (6, 6, N, N, N) float32


# ---------------------------------------------------------------------------
# Lane-dense (rows, 128) voxel layout helpers
# ---------------------------------------------------------------------------
def _row_layout(flat_len, target=None):
    """flat element count -> (tile_rows, padded_rows).
    padded_rows % tile_rows == 0, tile_rows is a multiple of 8 (or the full row
    extent).  For the common sizes (N a multiple of 8) the tile is an exact divisor
    of the natural row count, so no per-call padding of the fields is needed."""
    target = TARGET_ROWS if target is None else target
    rows = -(-flat_len // LANE)
    if rows <= target:
        # Split once so the megacore-parallel voxel axis has >= 2 tiles when the
        # problem is big enough to care.
        if rows >= 256 and rows % 16 == 0:
            return rows // 2, rows
        return rows, rows
    for t in range(target, 63, -8):          # largest multiple-of-8 divisor <= target
        if rows % t == 0:
            return t, rows
    padded = -(-rows // target) * target     # awkward sizes: pad as a fallback
    return target, padded


def _to_rows(x, padded_rows):
    """x: (..., V) -> (..., padded_rows, LANE), zero-padded along the last axis."""
    V = x.shape[-1]
    Vp = padded_rows * LANE
    if Vp != V:
        x = jnp.pad(x, [(0, 0)] * (x.ndim - 1) + [(0, Vp - V)])
    return x.reshape(x.shape[:-1] + (padded_rows, LANE))


def prepare_C_packed(C_field):
    """Per-voxel stiffness (B,6,6,N,N,N) -> (B,21,rows,128): the 21 unique planes of
    the symmetric Mandel 6x6, lane-dense.  Done ONCE at setup (C_field is fixed
    across the solver's fixed-point iterations), cutting constlaw HBM traffic ~30%
    per forward call.  Assumes major symmetry C_ij == C_ji (standard for elastic
    stiffness in Mandel notation)."""
    B = C_field.shape[0]
    V = math.prod(C_field.shape[-3:])
    Cf = C_field.reshape(B, 6, 6, V)
    tri = [Cf[:, i, j] for i in range(6) for j in range(i, 6)]
    Cp = jnp.stack(tri, axis=1).astype(jnp.float32)            # (B, 21, V)
    _, rows = _row_layout(V)
    return _to_rows(Cp, rows)                                  # (B, 21, rows, 128)


def prepare_G_packed(G_sym, N):
    """Pack the real, symmetric Mandel Green's operator for the rfft half-spectrum:
    21 unique planes, each value duplicated onto adjacent (re, im) lane pairs so the
    gamma kernel consumes the interleaved-complex spectrum directly.  Setup-time
    buffer (register_buffer analogue), not per forward call."""
    # TODO(synk): a rank-structured q-based Gamma (3 planes instead of 21) would cut
    # operator traffic ~7x more (esp. v7x) but needs in-kernel Nyquist/DC masking.
    Nh = N // 2 + 1
    Vh = N * N * Nh
    Gh = G_sym[..., :Nh].reshape(6, 6, Vh)
    tri = [Gh[i, j] for i in range(6) for j in range(i, 6)]
    Gp = jnp.stack(tri, axis=0).astype(jnp.float32)            # (21, Vh)
    Gp = jnp.repeat(Gp, 2, axis=-1)                            # (21, 2*Vh) re/im pairs
    _, rows = _row_layout(2 * Vh)
    return _to_rows(Gp, rows)                                  # (21, rows, 128)


# ---------------------------------------------------------------------------
# Pallas kernel (shared by constlaw and gamma): symmetric 6x6 per-voxel matvec
# ---------------------------------------------------------------------------
def _for_each_chunk(total_rows, fn):
    """Run fn(row_start, row_count) over row chunks.  Uses a rolled fori_loop
    (bounded vreg live set at large tiles) when chunks divide evenly; otherwise a
    tiny static Python loop (small / ragged tiles only)."""
    if total_rows > CHUNK_ROWS and total_rows % CHUNK_ROWS == 0:
        def body(ci, carry):
            fn(pl.multiple_of(ci * CHUNK_ROWS, CHUNK_ROWS), CHUNK_ROWS)
            return carry
        jax.lax.fori_loop(0, total_rows // CHUNK_ROWS, body, 0)
    else:
        for r0 in range(0, total_rows, CHUNK_ROWS):
            fn(r0, min(CHUNK_ROWS, total_rows - r0))


def _sym66_matvec_kernel(a_ref, x_ref, y_ref):
    # a_ref : (21, TR, 128)  packed upper triangle of a symmetric 6x6 operator
    # x_ref : (6, TR, 128)   input field planes
    # y_ref : (6, TR, 128)   y_i = sum_j A[_TRI[i][j]] * x_j  at every lane
    def do_chunk(r0, nrows):
        sl = pl.ds(r0, nrows)
        x = [x_ref[j, sl, :] for j in range(6)]
        for i in range(6):
            acc = a_ref[_TRI[i][0], sl, :] * x[0]
            for j in range(1, 6):
                acc = acc + a_ref[_TRI[i][j], sl, :] * x[j]
            y_ref[i, sl, :] = acc

    _for_each_chunk(x_ref.shape[1], do_chunk)


def constlaw_matvec(C_pack, e_flat):
    """sigma[b,i,v] = sum_j C[b,i,j,v] * eps[b,j,v] with symmetric-packed C."""
    B, _, rows, _ = C_pack.shape
    V = e_flat.shape[-1]
    tile, rows_v = _row_layout(V)
    assert rows_v == rows, "C_pack layout does not match the strain field size"
    er = _to_rows(e_flat, rows)                                # (B, 6, rows, 128)
    out = pl.pallas_call(
        _sym66_matvec_kernel,
        out_shape=jax.ShapeDtypeStruct((B, 6, rows, LANE), jnp.float32),
        grid_spec=pltpu.PrefetchScalarGridSpec(
            num_scalar_prefetch=0,
            grid=(rows // tile, B),
            in_specs=[
                pl.BlockSpec((None, 21, tile, LANE), lambda r, b: (b, 0, r, 0)),
                pl.BlockSpec((None, 6, tile, LANE), lambda r, b: (b, 0, r, 0)),
            ],
            out_specs=pl.BlockSpec((None, 6, tile, LANE), lambda r, b: (b, 0, r, 0)),
        ),
        compiler_params=pltpu.CompilerParams(
            dimension_semantics=("parallel", "parallel"),
            vmem_limit_bytes=VMEM_LIMIT),
    )(C_pack, er)
    return out.reshape(B, 6, rows * LANE)[..., :V]


def gamma_matvec(G_pack, x_ri):
    """y[b,i,:] = sum_j G[i,j,:] * x[b,j,:] on the interleaved (re,im) half-spectrum.

    Grid is (voxel_tiles, batch) with batch innermost; when there are >= 2 voxel
    tiles the batch axis is 'arbitrary' so the batch-invariant G block keeps the
    same block index across consecutive steps and is only DMA'd once per tile.
    """
    B, _, L = x_ri.shape
    rows = G_pack.shape[1]
    tile, rows_v = _row_layout(L)
    assert rows_v == rows, "G_pack layout does not match the spectrum size"
    xr = _to_rows(x_ri, rows)                                  # (B, 6, rows, 128)
    n_tiles = rows // tile
    dims = ("parallel", "arbitrary") if n_tiles > 1 else ("parallel", "parallel")
    y = pl.pallas_call(
        _sym66_matvec_kernel,
        out_shape=jax.ShapeDtypeStruct((B, 6, rows, LANE), jnp.float32),
        grid_spec=pltpu.PrefetchScalarGridSpec(
            num_scalar_prefetch=0,
            grid=(n_tiles, B),
            in_specs=[
                pl.BlockSpec((21, tile, LANE), lambda r, b: (0, r, 0)),
                pl.BlockSpec((None, 6, tile, LANE), lambda r, b: (b, 0, r, 0)),
            ],
            out_specs=pl.BlockSpec((None, 6, tile, LANE), lambda r, b: (b, 0, r, 0)),
        ),
        compiler_params=pltpu.CompilerParams(
            dimension_semantics=dims,
            vmem_limit_bytes=VMEM_LIMIT),
    )(G_pack, xr)
    return y.reshape(B, 6, rows * LANE)[..., :L]


# ---------------------------------------------------------------------------
# GreensOp.forward (use_polar=False)
# ---------------------------------------------------------------------------
def greens_op_forward(G_pack, C_pack, eps_k):
    """
    G_pack : (21, Rh, 128) f32   -- prepare_G_packed(compute_G_freq(...), N)
    C_pack : (B, 21, R, 128) f32 -- prepare_C_packed(C_field)      (setup-time)
    eps_k  : (B, 6, N, N, N) f32
    returns eps_kp = eps_k - Gamma(C_field : eps_k), shape (B, 6, N, N, N)
    """
    B = eps_k.shape[0]
    Ns = tuple(eps_k.shape[-3:])
    V = Ns[0] * Ns[1] * Ns[2]
    Nh = Ns[2] // 2 + 1
    Vh = Ns[0] * Ns[1] * Nh

    # sigma = constlaw(C_field, eps_k): per-voxel symmetric Mandel matvec (Pallas).
    e_flat = eps_k.reshape(B, 6, V)
    sigma = constlaw_matvec(C_pack, e_flat).reshape((B, 6) + Ns)

    # TODO(synk): 3-D rFFT / irFFT have no clean Pallas equivalent; stay on XLA FFT.
    x_ft = jnp.fft.rfftn(sigma, axes=(-3, -2, -1))             # (B,6,N,N,Nh) c64
    # Interleave (re, im) on the lane axis: one fused XLA pass in, and the kernel
    # output converts straight back to complex (no separate real/imag temporaries
    # feeding two kernel inputs + a lax.complex recombine of two full arrays).
    x_ri = jnp.stack((jnp.real(x_ft), jnp.imag(x_ft)), axis=-1).reshape(B, 6, 2 * Vh)

    # Frequency-domain 'ijxyz, bjxyz -> bixyz' on the half-spectrum (Pallas kernel).
    y_ri = gamma_matvec(G_pack, x_ri).reshape((B, 6) + Ns[:2] + (Nh, 2))
    y_ft = jax.lax.complex(y_ri[..., 0], y_ri[..., 1])

    # The rfft half-spectrum path is valid because G is real and EVEN in q
    # (even-degree products of the Willot-modified q, plus the real S_ref Nyquist
    # fill and zero DC), so y_ft keeps Hermitian symmetry and
    # irfftn(y_ft) == Re(ifftn(full-spectrum y)).
    eps_pert = jnp.fft.irfftn(y_ft, s=Ns, axes=(-3, -2, -1)).astype(eps_k.dtype)
    return eps_k - eps_pert


def greens_op_forward_reference(G_sym, C_field, eps_k):
    """Pure-JAX reference: full complex FFT path, dense 6x6 G (module semantics)."""
    sigma = jnp.einsum('bijxyz,bjxyz->bixyz', C_field, eps_k)
    x_ft = jnp.fft.fftn(sigma, axes=(-3, -2, -1))
    y_ft = jnp.einsum('ijxyz,bjxyz->bixyz', G_sym.astype(jnp.complex64), x_ft)
    y = jnp.real(jnp.fft.ifftn(y_ft, axes=(-3, -2, -1)))
    return eps_k - y.astype(eps_k.dtype)


def _run_case(N, B, lamb_0, mu_0, J, I6, S_ref, key):
    G_sym = compute_G_freq(N, lamb_0, mu_0, S_ref, willot=True, validate=True)
    G_pack = prepare_G_packed(G_sym, N)   # setup-time buffer (register_buffer analogue)

    k1, k2 = jax.random.split(key)
    eps_k = jax.random.normal(k1, (B, 6, N, N, N), dtype=jnp.float32)
    contrast = jax.random.uniform(k2, (B, N, N, N), minval=0.5, maxval=2.0,
                                  dtype=jnp.float32)
    lamb_f = lamb_0 * contrast
    mu_f = mu_0 * contrast
    # Per-voxel isotropic stiffness in Mandel form (symmetric by construction).
    C_field = (lamb_f[:, None, None] * J[None, :, :, None, None, None]
               + 2.0 * mu_f[:, None, None] * I6[None, :, :, None, None, None])
    C_pack = prepare_C_packed(C_field)    # setup-time packing (fixed across solver iters)

    out = jax.jit(greens_op_forward)(G_pack, C_pack, eps_k)
    out = jax.block_until_ready(out)
    assert out.shape == (B, 6, N, N, N)
    assert out.dtype == jnp.float32

    # Validate against the pure-JAX reference (full complex FFT / dense G path).
    # The residual gap is fft-vs-rfft algorithm + accumulation-order rounding in f32.
    ref = jax.block_until_ready(greens_op_forward_reference(G_sym, C_field, eps_k))
    err = float(jnp.max(jnp.abs(out - ref)))
    assert err < 2e-3, f"N={N}: mismatch vs reference: {err}"
    return err


if __name__ == "__main__":
    # Reference isotropic constitutive law (deterministic, no checkpoint load).
    lamb_0, mu_0 = 1.0, 0.5
    I6 = jnp.eye(6, dtype=jnp.float32)
    J = jnp.zeros((6, 6), jnp.float32).at[:3, :3].set(1.0)
    C_ref = lamb_0 * J + 2.0 * mu_0 * I6
    S_ref = jnp.linalg.inv(C_ref)

    key = jax.random.PRNGKey(0)
    k_small, k_big = jax.random.split(key)

    # N=8: tiny smoke test (exercises the ragged / sublane-masked tile path; do not
    # benchmark at this size).  N=32: exercises the fori_loop chunking and the
    # 2-tile megacore-parallel voxel grid.
    _run_case(8, 2, lamb_0, mu_0, J, I6, S_ref, k_small)
    _run_case(32, 2, lamb_0, mu_0, J, I6, S_ref, k_big)
    print("KERNEL_OK")
</pallas_src>

<mosaic_0001>
module attributes {stable_mosaic.version = 11 : i64} {
  func.func @_sym66_matvec_kernel(%arg0: i32, %arg1: i32, %arg2: memref<1x21x4x128xf32, #tpu.memory_space<vmem>>, %arg3: memref<1x6x4x128xf32, #tpu.memory_space<vmem>>, %arg4: memref<1x6x4x128xf32, #tpu.memory_space<vmem>>) attributes {dimension_semantics = [#tpu.dimension_semantics<parallel>, #tpu.dimension_semantics<parallel>], iteration_bounds = array<i64: 1, 2>, scalar_prefetch = 0 : i64, scratch_operands = 0 : i64, tpu.core_type = #tpu.core_type<tc>, window_params = [{transform_indices = @transform_0, window_bounds = array<i64: 1, 21, 4, 128>}, {transform_indices = @transform_1, window_bounds = array<i64: 1, 6, 4, 128>}, {transform_indices = @transform_2, window_bounds = array<i64: 1, 6, 4, 128>}]} {
    %c0 = arith.constant 0 : index
    %c0_0 = arith.constant 0 : index
    %c0_1 = arith.constant 0 : index
    %c0_2 = arith.constant 0 : index
    %0 = vector.load %arg3[%c0, %c0_0, %c0_1, %c0_2] : memref<1x6x4x128xf32, #tpu.memory_space<vmem>>, vector<1x1x4x128xf32>
    %1 = vector.shape_cast %0 : vector<1x1x4x128xf32> to vector<4x128xf32>
    %c0_3 = arith.constant 0 : index
    %c1 = arith.constant 1 : index
    %c0_4 = arith.constant 0 : index
    %c0_5 = arith.constant 0 : index
    %2 = vector.load %arg3[%c0_3, %c1, %c0_4, %c0_5] : memref<1x6x4x128xf32, #tpu.memory_space<vmem>>, vector<1x1x4x128xf32>
    %3 = vector.shape_cast %2 : vector<1x1x4x128xf32> to vector<4x128xf32>
    %c0_6 = arith.constant 0 : index
    %c2 = arith.constant 2 : index
    %c0_7 = arith.constant 0 : index
    %c0_8 = arith.constant 0 : index
    %4 = vector.load %arg3[%c0_6, %c2, %c0_7, %c0_8] : memref<1x6x4x128xf32, #tpu.memory_space<vmem>>, vector<1x1x4x128xf32>
    %5 = vector.shape_cast %4 : vector<1x1x4x128xf32> to vector<4x128xf32>
    %c0_9 = arith.constant 0 : index
    %c3 = arith.constant 3 : index
    %c0_10 = arith.constant 0 : index
    %c0_11 = arith.constant 0 : index
    %6 = vector.load %arg3[%c0_9, %c3, %c0_10, %c0_11] : memref<1x6x4x128xf32, #tpu.memory_space<vmem>>, vector<1x1x4x128xf32>
    %7 = vector.shape_cast %6 : vector<1x1x4x128xf32> to vector<4x128xf32>
    %c0_12 = arith.constant 0 : index
    %c4 = arith.constant 4 : index
    %c0_13 = arith.constant 0 : index
    %c0_14 = arith.constant 0 : index
    %8 = vector.load %arg3[%c0_12, %c4, %c0_13, %c0_14] : memref<1x6x4x128xf32, #tpu.memory_space<vmem>>, vector<1x1x4x128xf32>
    %9 = vector.shape_cast %8 : vector<1x1x4x128xf32> to vector<4x128xf32>
    %c0_15 = arith.constant 0 : index
    %c5 = arith.constant 5 : index
    %c0_16 = arith.constant 0 : index
    %c0_17 = arith.constant 0 : index
    %10 = vector.load %arg3[%c0_15, %c5, %c0_16, %c0_17] : memref<1x6x4x128xf32, #tpu.memory_space<vmem>>, vector<1x1x4x128xf32>
    %11 = vector.shape_cast %10 : vector<1x1x4x128xf32> to vector<4x128xf32>
    %c0_18 = arith.constant 0 : index
    %c0_19 = arith.constant 0 : index
    %c0_20 = arith.constant 0 : index
    %c0_21 = arith.constant 0 : index
    %12 = vector.load %arg2[%c0_18, %c0_19, %c0_20, %c0_21] : memref<1x21x4x128xf32, #tpu.memory_space<vmem>>, vector<1x1x4x128xf32>
    %13 = vector.shape_cast %12 : vector<1x1x4x128xf32> to vector<4x128xf32>
    %14 = arith.mulf %13, %1 : vector<4x128xf32>
    %c0_22 = arith.constant 0 : index
    %c1_23 = arith.constant 1 : index
    %c0_24 = arith.constant 0 : index
    %c0_25 = arith.constant 0 : index
    %15 = vector.load %arg2[%c0_22, %c1_23, %c0_24, %c0_25] : memref<1x21x4x128xf32, #tpu.memory_space<vmem>>, vector<1x1x4x128xf32>
    %16 = vector.shape_cast %15 : vector<1x1x4x128xf32> to vector<4x128xf32>
    %17 = arith.mulf %16, %3 : vector<4x128xf32>
    %18 = arith.addf %14, %17 : vector<4x128xf32>
    %c0_26 = arith.constant 0 : index
    %c2_27 = arith.constant 2 : index
    %c0_28 = arith.constant 0 : index
    %c0_29 = arith.constant 0 : index
    %19 = vector.load %arg2[%c0_26, %c2_27, %c0_28, %c0_29] : memref<1x21x4x128xf32, #tpu.memory_space<vmem>>, vector<1x1x4x128xf32>
    %20 = vector.shape_cast %19 : vector<1x1x4x128xf32> to vector<4x128xf32>
    %21 = arith.mulf %20, %5 : vector<4x128xf32>
    %22 = arith.addf %18, %21 : vector<4x128xf32>
    %c0_30 = arith.constant 0 : index
    %c3_31 = arith.constant 3 : index
    %c0_32 = arith.constant 0 : index
    %c0_33 = arith.constant 0 : index
    %23 = vector.load %arg2[%c0_30, %c3_31, %c0_32, %c0_33] : memref<1x21x4x128xf32, #tpu.memory_space<vmem>>, vector<1x1x4x128xf32>
    %24 = vector.shape_cast %23 : vector<1x1x4x128xf32> to vector<4x128xf32>
    %25 = arith.mulf %24, %7 : vector<4x128xf32>
    %26 = arith.addf %22, %25 : vector<4x128xf32>
    %c0_34 = arith.constant 0 : index
    %c4_35 = arith.constant 4 : index
    %c0_36 = arith.constant 0 : index
    %c0_37 = arith.constant 0 : index
    %27 = vector.load %arg2[%c0_34, %c4_35, %c0_36, %c0_37] : memref<1x21x4x128xf32, #tpu.memory_space<vmem>>, vector<1x1x4x128xf32>
    %28 = vector.shape_cast %27 : vector<1x1x4x128xf32> to vector<4x128xf32>
    %29 = arith.mulf %28, %9 : vector<4x128xf32>
    %30 = arith.addf %26, %29 : vector<4x128xf32>
    %c0_38 = arith.constant 0 : index
    %c5_39 = arith.constant 5 : index
    %c0_40 = arith.constant 0 : index
    %c0_41 = arith.constant 0 : index
    %31 = vector.load %arg2[%c0_38, %c5_39, %c0_40, %c0_41] : memref<1x21x4x128xf32, #tpu.memory_space<vmem>>, vector<1x1x4x128xf32>
    %32 = vector.shape_cast %31 : vector<1x1x4x128xf32> to vector<4x128xf32>
    %33 = arith.mulf %32, %11 : vector<4x128xf32>
    %34 = arith.addf %30, %33 : vector<4x128xf32>
    %c0_42 = arith.constant 0 : index
    %c0_43 = arith.constant 0 : index
    %c0_44 = arith.constant 0 : index
    %c0_45 = arith.constant 0 : index
    %35 = vector.load %arg4[%c0_42, %c0_43, %c0_44, %c0_45] : memref<1x6x4x128xf32, #tpu.memory_space<vmem>>, vector<1x1x4x128xf32>
    %36 = vector.shape_cast %35 : vector<1x1x4x128xf32> to vector<4x128xf32>
    %37 = vector.shape_cast %34 : vector<4x128xf32> to vector<1x1x4x128xf32>
    tpu.vector_store %arg4[%c0_42, %c0_43, %c0_44, %c0_45], %37 {strides = array<i32>} : memref<1x6x4x128xf32, #tpu.memory_space<vmem>>, vector<1x1x4x128xf32>,
    %c0_46 = arith.constant 0 : index
    %c1_47 = arith.constant 1 : index
    %c0_48 = arith.constant 0 : index
    %c0_49 = arith.constant 0 : index
    %38 = vector.load %arg2[%c0_46, %c1_47, %c0_48, %c0_49] : memref<1x21x4x128xf32, #tpu.memory_space<vmem>>, vector<1x1x4x128xf32>
    %39 = vector.shape_cast %38 : vector<1x1x4x128xf32> to vector<4x128xf32>
    %40 = arith.mulf %39, %1 : vector<4x128xf32>
    %c0_50 = arith.constant 0 : index
    %c6 = arith.constant 6 : index
    %c0_51 = arith.constant 0 : index
    %c0_52 = arith.constant 0 : index
    %41 = vector.load %arg2[%c0_50, %c6, %c0_51, %c0_52] : memref<1x21x4x128xf32, #tpu.memory_space<vmem>>, vector<1x1x4x128xf32>
    %42 = vector.shape_cast %41 : vector<1x1x4x128xf32> to vector<4x128xf32>
    %43 = arith.mulf %42, %3 : vector<4x128xf32>
    %44 = arith.addf %40, %43 : vector<4x128xf32>
    %c0_53 = arith.constant 0 : index
    %c7 = arith.constant 7 : index
    %c0_54 = arith.constant 0 : index
    %c0_55 = arith.constant 0 : index
    %45 = vector.load %arg2[%c0_53, %c7, %c0_54, %c0_55] : memref<1x21x4x128xf32, #tpu.memory_space<vmem>>, vector<1x1x4x128xf32>
    %46 = vector.shape_cast %45 : vector<1x1x4x128xf32> to vector<4x128xf32>
    %47 = arith.mulf %46, %5 : vector<4x128xf32>
    %48 = arith.addf %44, %47 : vector<4x128xf32>
    %c0_56 = arith.constant 0 : index
    %c8 = arith.constant 8 : index
    %c0_57 = arith.constant 0 : index
    %c0_58 = arith.constant 0 : index
    %49 = vector.load %arg2[%c0_56, %c8, %c0_57, %c0_58] : memref<1x21x4x128xf32, #tpu.memory_space<vmem>>, vector<1x1x4x128xf32>
    %50 = vector.shape_cast %49 : vector<1x1x4x128xf32> to vector<4x128xf32>
    %51 = arith.mulf %50, %7 : vector<4x128xf32>
    %52 = arith.addf %48, %51 : vector<4x128xf32>
    %c0_59 = arith.constant 0 : index
    %c9 = arith.constant 9 : index
    %c0_60 = arith.constant 0 : index
    %c0_61 = arith.constant 0 : index
    %53 = vector.load %arg2[%c0_59, %c9, %c0_60, %c0_61] : memref<1x21x4x128xf32, #tpu.memory_space<vmem>>, vector<1x1x4x128xf32>
    %54 = vector.shape_cast %53 : vector<1x1x4x128xf32> to vector<4x128xf32>
    %55 = arith.mulf %54, %9 : vector<4x128xf32>
    %56 = arith.addf %52, %55 : vector<4x128xf32>
    %c0_62 = arith.constant 0 : index
    %c10 = arith.constant 10 : index
    %c0_63 = arith.constant 0 : index
    %c0_64 = arith.constant 0 : index
    %57 = vector.load %arg2[%c0_62, %c10, %c0_63, %c0_64] : memref<1x21x4x128xf32, #tpu.memory_space<vmem>>, vector<1x1x4x128xf32>
    %58 = vector.shape_cast %57 : vector<1x1x4x128xf32> to vector<4x128xf32>
    %59 = arith.mulf %58, %11 : vector<4x128xf32>
    %60 = arith.addf %56, %59 : vector<4x128xf32>
    %c0_65 = arith.constant 0 : index
    %c1_66 = arith.constant 1 : index
    %c0_67 = arith.constant 0 : index
    %c0_68 = arith.constant 0 : index
    %61 = vector.load %arg4[%c0_65, %c1_66, %c0_67, %c0_68] : memref<1x6x4x128xf32, #tpu.memory_space<vmem>>, vector<1x1x4x128xf32>
    %62 = vector.shape_cast %61 : vector<1x1x4x128xf32> to vector<4x128xf32>
    %63 = vector.shape_cast %60 : vector<4x128xf32> to vector<1x1x4x128xf32>
    tpu.vector_store %arg4[%c0_65, %c1_66, %c0_67, %c0_68], %63 {strides = array<i32>} : memref<1x6x4x128xf32, #tpu.memory_space<vmem>>, vector<1x1x4x128xf32>,
    %c0_69 = arith.constant 0 : index
    %c2_70 = arith.constant 2 : index
    %c0_71 = arith.constant 0 : index
    %c0_72 = arith.constant 0 : index
    %64 = vector.load %arg2[%c0_69, %c2_70, %c0_71, %c0_72] : memref<1x21x4x128xf32, #tpu.memory_space<vmem>>, vector<1x1x4x128xf32>
    %65 = vector.shape_cast %64 : vector<1x1x4x128xf32> to vector<4x128xf32>
    %66 = arith.mulf %65, %1 : vector<4x128xf32>
    %c0_73 = arith.constant 0 : index
    %c7_74 = arith.constant 7 : index
    %c0_75 = arith.constant 0 : index
    %c0_76 = arith.constant 0 : index
    %67 = vector.load %arg2[%c0_73, %c7_74, %c0_75, %c0_76] : memref<1x21x4x128xf32, #tpu.memory_space<vmem>>, vector<1x1x4x128xf32>
    %68 = vector.shape_cast %67 : vector<1x1x4x128xf32> to vector<4x128xf32>
    %69 = arith.mulf %68, %3 : vector<4x128xf32>
    %70 = arith.addf %66, %69 : vector<4x128xf32>
    %c0_77 = arith.constant 0 : index
    %c11 = arith.constant 11 : index
    %c0_78 = arith.constant 0 : index
    %c0_79 = arith.constant 0 : index
    %71 = vector.load %arg2[%c0_77, %c11, %c0_78, %c0_79] : memref<1x21x4x128xf32, #tpu.memory_space<vmem>>, vector<1x1x4x128xf32>
    %72 = vector.shape_cast %71 : vector<1x1x4x128xf32> to vector<4x128xf32>
    %73 = arith.mulf %72, %5 : vector<4x128xf32>
    %74 = arith.addf %70, %73 : vector<4x128xf32>
    %c0_80 = arith.constant 0 : index
    %c12 = arith.constant 12 : index
    %c0_81 = arith.constant 0 : index
    %c0_82 = arith.constant 0 : index
    %75 = vector.load %arg2[%c0_80, %c12, %c0_81, %c0_82] : memref<1x21x4x128xf32, #tpu.memory_space<vmem>>, vector<1x1x4x128xf32>
    %76 = vector.shape_cast %75 : vector<1x1x4x128xf32> to vector<4x128xf32>
    %77 = arith.mulf %76, %7 : vector<4x128xf32>
    %78 = arith.addf %74, %77 : vector<4x128xf32>
    %c0_83 = arith.constant 0 : index
    %c13 = arith.constant 13 : index
    %c0_84 = arith.constant 0 : index
    %c0_85 = arith.constant 0 : index
    %79 = vector.load %arg2[%c0_83, %c13, %c0_84, %c0_85] : memref<1x21x4x128xf32, #tpu.memory_space<vmem>>, vector<1x1x4x128xf32>
    %80 = vector.shape_cast %79 : vector<1x1x4x128xf32> to vector<4x128xf32>
    %81 = arith.mulf %80, %9 : vector<4x128xf32>
    %82 = arith.addf %78, %81 : vector<4x128xf32>
    %c0_86 = arith.constant 0 : index
    %c14 = arith.constant 14 : index
    %c0_87 = arith.constant 0 : index
    %c0_88 = arith.constant 0 : index
    %83 = vector.load %arg2[%c0_86, %c14, %c0_87, %c0_88] : memref<1x21x4x128xf32, #tpu.memory_space<vmem>>, vector<1x1x4x128xf32>
    %84 = vector.shape_cast %83 : vector<1x1x4x128xf32> to vector<4x128xf32>
    %85 = arith.mulf %84, %11 : vector<4x128xf32>
    %86 = arith.addf %82, %85 : vector<4x128xf32>
    %c0_89 = arith.constant 0 : index
    %c2_90 = arith.constant 2 : index
    %c0_91 = arith.constant 0 : index
    %c0_92 = arith.constant 0 : index
    %87 = vector.load %arg4[%c0_89, %c2_90, %c0_91, %c0_92] : memref<1x6x4x128xf32, #tpu.memory_space<vmem>>, vector<1x1x4x128xf32>
    %88 = vector.shape_cast %87 : vector<1x1x4x128xf32> to vector<4x128xf32>
    %89 = vector.shape_cast %86 : vector<4x128xf32> to vector<1x1x4x128xf32>
    tpu.vector_store %arg4[%c0_89, %c2_90, %c0_91, %c0_92], %89 {strides = array<i32>} : memref<1x6x4x128xf32, #tpu.memory_space<vmem>>, vector<1x1x4x128xf32>,
    %c0_93 = arith.constant 0 : index
    %c3_94 = arith.constant 3 : index
    %c0_95 = arith.constant 0 : index
    %c0_96 = arith.constant 0 : index
    %90 = vector.load %arg2[%c0_93, %c3_94, %c0_95, %c0_96] : memref<1x21x4x128xf32, #tpu.memory_space<vmem>>, vector<1x1x4x128xf32>
    %91 = vector.shape_cast %90 : vector<1x1x4x128xf32> to vector<4x128xf32>
    %92 = arith.mulf %91, %1 : vector<4x128xf32>
    %c0_97 = arith.constant 0 : index
    %c8_98 = arith.constant 8 : index
    %c0_99 = arith.constant 0 : index
    %c0_100 = arith.constant 0 : index
    %93 = vector.load %arg2[%c0_97, %c8_98, %c0_99, %c0_100] : memref<1x21x4x128xf32, #tpu.memory_space<vmem>>, vector<1x1x4x128xf32>
    %94 = vector.shape_cast %93 : vector<1x1x4x128xf32> to vector<4x128xf32>
    %95 = arith.mulf %94, %3 : vector<4x128xf32>
    %96 = arith.addf %92, %95 : vector<4x128xf32>
    %c0_101 = arith.constant 0 : index
    %c12_102 = arith.constant 12 : index
    %c0_103 = arith.constant 0 : index
    %c0_104 = arith.constant 0 : index
    %97 = vector.load %arg2[%c0_101, %c12_102, %c0_103, %c0_104] : memref<1x21x4x128xf32, #tpu.memory_space<vmem>>, vector<1x1x4x128xf32>
    %98 = vector.shape_cast %97 : vector<1x1x4x128xf32> to vector<4x128xf32>
    %99 = arith.mulf %98, %5 : vector<4x128xf32>
    %100 = arith.addf %96, %99 : vector<4x128xf32>
    %c0_105 = arith.constant 0 : index
    %c15 = arith.constant 15 : index
    %c0_106 = arith.constant 0 : index
    %c0_107 = arith.constant 0 : index
    %101 = vector.load %arg2[%c0_105, %c15, %c0_106, %c0_107] : memref<1x21x4x128xf32, #tpu.memory_space<vmem>>, vector<1x1x4x128xf32>
    %102 = vector.shape_cast %101 : vector<1x1x4x128xf32> to vector<4x128xf32>
    %103 = arith.mulf %102, %7 : vector<4x128xf32>
    %104 = arith.addf %100, %103 : vector<4x128xf32>
    %c0_108 = arith.constant 0 : index
    %c16 = arith.constant 16 : index
    %c0_109 = arith.constant 0 : index
    %c0_110 = arith.constant 0 : index
    %105 = vector.load %arg2[%c0_108, %c16, %c0_109, %c0_110] : memref<1x21x4x128xf32, #tpu.memory_space<vmem>>, vector<1x1x4x128xf32>
    %106 = vector.shape_cast %105 : vector<1x1x4x128xf32> to vector<4x128xf32>
    %107 = arith.mulf %106, %9 : vector<4x128xf32>
    %108 = arith.addf %104, %107 : vector<4x128xf32>
    %c0_111 = arith.constant 0 : index
    %c17 = arith.constant 17 : index
    %c0_112 = arith.constant 0 : index
    %c0_113 = arith.constant 0 : index
    %109 = vector.load %arg2[%c0_111, %c17, %c0_112, %c0_113] : memref<1x21x4x128xf32, #tpu.memory_space<vmem>>, vector<1x1x4x128xf32>
    %110 = vector.shape_cast %109 : vector<1x1x4x128xf32> to vector<4x128xf32>
    %111 = arith.mulf %110, %11 : vector<4x128xf32>
    %112 = arith.addf %108, %111 : vector<4x128xf32>
    %c0_114 = arith.constant 0 : index
    %c3_115 = arith.constant 3 : index
    %c0_116 = arith.constant 0 : index
    %c0_117 = arith.constant 0 : index
    %113 = vector.load %arg4[%c0_114, %c3_115, %c0_116, %c0_117] : memref<1x6x4x128xf32, #tpu.memory_space<vmem>>, vector<1x1x4x128xf32>
    %114 = vector.shape_cast %113 : vector<1x1x4x128xf32> to vector<4x128xf32>
    %115 = vector.shape_cast %112 : vector<4x128xf32> to vector<1x1x4x128xf32>
    tpu.vector_store %arg4[%c0_114, %c3_115, %c0_116, %c0_117], %115 {strides = array<i32>} : memref<1x6x4x128xf32, #tpu.memory_space<vmem>>, vector<1x1x4x128xf32>,
    %c0_118 = arith.constant 0 : index
    %c4_119 = arith.constant 4 : index
    %c0_120 = arith.constant 0 : index
    %c0_121 = arith.constant 0 : index
    %116 = vector.load %arg2[%c0_118, %c4_119, %c0_120, %c0_121] : memref<1x21x4x128xf32, #tpu.memory_space<vmem>>, vector<1x1x4x128xf32>
    %117 = vector.shape_cast %116 : vector<1x1x4x128xf32> to vector<4x128xf32>
    %118 = arith.mulf %117, %1 : vector<4x128xf32>
    %c0_122 = arith.constant 0 : index
    %c9_123 = arith.constant 9 : index
    %c0_124 = arith.constant 0 : index
    %c0_125 = arith.constant 0 : index
    %119 = vector.load %arg2[%c0_122, %c9_123, %c0_124, %c0_125] : memref<1x21x4x128xf32, #tpu.memory_space<vmem>>, vector<1x1x4x128xf32>
    %120 = vector.shape_cast %119 : vector<1x1x4x128xf32> to vector<4x128xf32>
    %121 = arith.mulf %120, %3 : vector<4x128xf32>
    %122 = arith.addf %118, %121 : vector<4x128xf32>
    %c0_126 = arith.constant 0 : index
    %c13_127 = arith.constant 13 : index
    %c0_128 = arith.constant 0 : index
    %c0_129 = arith.constant 0 : index
    %123 = vector.load %arg2[%c0_126, %c13_127, %c0_128, %c0_129] : memref<1x21x4x128xf32, #tpu.memory_space<vmem>>, vector<1x1x4x128xf32>
    %124 = vector.shape_cast %123 : vector<1x1x4x128xf32> to vector<4x128xf32>
    %125 = arith.mulf %124, %5 : vector<4x128xf32>
    %126 = arith.addf %122, %125 : vector<4x128xf32>
    %c0_130 = arith.constant 0 : index
    %c16_131 = arith.constant 16 : index
    %c0_132 = arith.constant 0 : index
    %c0_133 = arith.constant 0 : index
    %127 = vector.load %arg2[%c0_130, %c16_131, %c0_132, %c0_133] : memref<1x21x4x128xf32, #tpu.memory_space<vmem>>, vector<1x1x4x128xf32>
    %128 = vector.shape_cast %127 : vector<1x1x4x128xf32> to vector<4x128xf32>
    %129 = arith.mulf %128, %7 : vector<4x128xf32>
    %130 = arith.addf %126, %129 : vector<4x128xf32>
    %c0_134 = arith.constant 0 : index
    %c18 = arith.constant 18 : index
    %c0_135 = arith.constant 0 : index
    %c0_136 = arith.constant 0 : index
    %131 = vector.load %arg2[%c0_134, %c18, %c0_135, %c0_136] : memref<1x21x4x128xf32, #tpu.memory_space<vmem>>, vector<1x1x4x128xf32>
    %132 = vector.shape_cast %131 : vector<1x1x4x128xf32> to vector<4x128xf32>
    %133 = arith.mulf %132, %9 : vector<4x128xf32>
    %134 = arith.addf %130, %133 : vector<4x128xf32>
    %c0_137 = arith.constant 0 : index
    %c19 = arith.constant 19 : index
    %c0_138 = arith.constant 0 : index
    %c0_139 = arith.constant 0 : index
    %135 = vector.load %arg2[%c0_137, %c19, %c0_138, %c0_139] : memref<1x21x4x128xf32, #tpu.memory_space<vmem>>, vector<1x1x4x128xf32>
    %136 = vector.shape_cast %135 : vector<1x1x4x128xf32> to vector<4x128xf32>
    %137 = arith.mulf %136, %11 : vector<4x128xf32>
    %138 = arith.addf %134, %137 : vector<4x128xf32>
    %c0_140 = arith.constant 0 : index
    %c4_141 = arith.constant 4 : index
    %c0_142 = arith.constant 0 : index
    %c0_143 = arith.constant 0 : index
    %139 = vector.load %arg4[%c0_140, %c4_141, %c0_142, %c0_143] : memref<1x6x4x128xf32, #tpu.memory_space<vmem>>, vector<1x1x4x128xf32>
    %140 = vector.shape_cast %139 : vector<1x1x4x128xf32> to vector<4x128xf32>
    %141 = vector.shape_cast %138 : vector<4x128xf32> to vector<1x1x4x128xf32>
    tpu.vector_store %arg4[%c0_140, %c4_141, %c0_142, %c0_143], %141 {strides = array<i32>} : memref<1x6x4x128xf32, #tpu.memory_space<vmem>>, vector<1x1x4x128xf32>,
    %c0_144 = arith.constant 0 : index
    %c5_145 = arith.constant 5 : index
    %c0_146 = arith.constant 0 : index
    %c0_147 = arith.constant 0 : index
    %142 = vector.load %arg2[%c0_144, %c5_145, %c0_146, %c0_147] : memref<1x21x4x128xf32, #tpu.memory_space<vmem>>, vector<1x1x4x128xf32>
    %143 = vector.shape_cast %142 : vector<1x1x4x128xf32> to vector<4x128xf32>
    %144 = arith.mulf %143, %1 : vector<4x128xf32>
    %c0_148 = arith.constant 0 : index
    %c10_149 = arith.constant 10 : index
    %c0_150 = arith.constant 0 : index
    %c0_151 = arith.constant 0 : index
    %145 = vector.load %arg2[%c0_148, %c10_149, %c0_150, %c0_151] : memref<1x21x4x128xf32, #tpu.memory_space<vmem>>, vector<1x1x4x128xf32>
    %146 = vector.shape_cast %145 : vector<1x1x4x128xf32> to vector<4x128xf32>
    %147 = arith.mulf %146, %3 : vector<4x128xf32>
    %148 = arith.addf %144, %147 : vector<4x128xf32>
    %c0_152 = arith.constant 0 : index
    %c14_153 = arith.constant 14 : index
    %c0_154 = arith.constant 0 : index
    %c0_155 = arith.constant 0 : index
    %149 = vector.load %arg2[%c0_152, %c14_153, %c0_154, %c0_155] : memref<1x21x4x128xf32, #tpu.memory_space<vmem>>, vector<1x1x4x128xf32>
    %150 = vector.shape_cast %149 : vector<1x1x4x128xf32> to vector<4x128xf32>
    %151 = arith.mulf %150, %5 : vector<4x128xf32>
    %152 = arith.addf %148, %151 : vector<4x128xf32>
    %c0_156 = arith.constant 0 : index
    %c17_157 = arith.constant 17 : index
    %c0_158 = arith.constant 0 : index
    %c0_159 = arith.constant 0 : index
    %153 = vector.load %arg2[%c0_156, %c17_157, %c0_158, %c0_159] : memref<1x21x4x128xf32, #tpu.memory_space<vmem>>, vector<1x1x4x128xf32>
    %154 = vector.shape_cast %153 : vector<1x1x4x128xf32> to vector<4x128xf32>
    %155 = arith.mulf %154, %7 : vector<4x128xf32>
    %156 = arith.addf %152, %155 : vector<4x128xf32>
    %c0_160 = arith.constant 0 : index
    %c19_161 = arith.constant 19 : index
    %c0_162 = arith.constant 0 : index
    %c0_163 = arith.constant 0 : index
    %157 = vector.load %arg2[%c0_160, %c19_161, %c0_162, %c0_163] : memref<1x21x4x128xf32, #tpu.memory_space<vmem>>, vector<1x1x4x128xf32>
    %158 = vector.shape_cast %157 : vector<1x1x4x128xf32> to vector<4x128xf32>
    %159 = arith.mulf %158, %9 : vector<4x128xf32>
    %160 = arith.addf %156, %159 : vector<4x128xf32>
    %c0_164 = arith.constant 0 : index
    %c20 = arith.constant 20 : index
    %c0_165 = arith.constant 0 : index
    %c0_166 = arith.constant 0 : index
    %161 = vector.load %arg2[%c0_164, %c20, %c0_165, %c0_166] : memref<1x21x4x128xf32, #tpu.memory_space<vmem>>, vector<1x1x4x128xf32>
    %162 = vector.shape_cast %161 : vector<1x1x4x128xf32> to vector<4x128xf32>
    %163 = arith.mulf %162, %11 : vector<4x128xf32>
    %164 = arith.addf %160, %163 : vector<4x128xf32>
    %c0_167 = arith.constant 0 : index
    %c5_168 = arith.constant 5 : index
    %c0_169 = arith.constant 0 : index
    %c0_170 = arith.constant 0 : index
    %165 = vector.load %arg4[%c0_167, %c5_168, %c0_169, %c0_170] : memref<1x6x4x128xf32, #tpu.memory_space<vmem>>, vector<1x1x4x128xf32>
    %166 = vector.shape_cast %165 : vector<1x1x4x128xf32> to vector<4x128xf32>
    %167 = vector.shape_cast %164 : vector<4x128xf32> to vector<1x1x4x128xf32>
    tpu.vector_store %arg4[%c0_167, %c5_168, %c0_169, %c0_170], %167 {strides = array<i32>} : memref<1x6x4x128xf32, #tpu.memory_space<vmem>>, vector<1x1x4x128xf32>,
    return
  }
  func.func @transform_0(%arg0: i32, %arg1: i32) -> (i32, i32, i32, i32) {
    %c0_i32 = arith.constant 0 : i32
    %c0_i32_0 = arith.constant 0 : i32
    %c0_i32_1 = arith.constant 0 : i32
    return %arg1, %c0_i32, %arg0, %c0_i32_0 : i32, i32, i32, i32
  }
  func.func @transform_1(%arg0: i32, %arg1: i32) -> (i32, i32, i32, i32) {
    %c0_i32 = arith.constant 0 : i32
    %c0_i32_0 = arith.constant 0 : i32
    %c0_i32_1 = arith.constant 0 : i32
    return %arg1, %c0_i32, %arg0, %c0_i32_0 : i32, i32, i32, i32
  }
  func.func @transform_2(%arg0: i32, %arg1: i32) -> (i32, i32, i32, i32) {
    %c0_i32 = arith.constant 0 : i32
    %c0_i32_0 = arith.constant 0 : i32
    %c0_i32_1 = arith.constant 0 : i32
    return %arg1, %c0_i32, %arg0, %c0_i32_0 : i32, i32, i32, i32
  }
}

module attributes {stable_mosaic.version = 11 : i64} {
  func.func @_sym66_matvec_kernel(%arg0: i32, %arg1: i32, %arg2: memref<21x5x128xf32, #tpu.memory_space<vmem>>, %arg3: memref<1x6x5x128xf32, #tpu.memory_space<vmem>>, %arg4: memref<1x6x5x128xf32, #tpu.memory_space<vmem>>) attributes {dimension_semantics = [#tpu.dimension_semantics<parallel>, #tpu.dimension_semantics<parallel>], iteration_bounds = array<i64: 1, 2>, scalar_prefetch = 0 : i64, scratch_operands = 0 : i64, tpu.core_type = #tpu.core_type<tc>, window_params = [{transform_indices = @transform_0, window_bounds = array<i64: 21, 5, 128>}, {transform_indices = @transform_1, window_bounds = array<i64: 1, 6, 5, 128>}, {transform_indices = @transform_2, window_bounds = array<i64: 1, 6, 5, 128>}]} {
    %c0 = arith.constant 0 : index
    %c0_0 = arith.constant 0 : index
    %c0_1 = arith.constant 0 : index
    %c0_2 = arith.constant 0 : index
    %0 = vector.load %arg3[%c0, %c0_0, %c0_1, %c0_2] : memref<1x6x5x128xf32, #tpu.memory_space<vmem>>, vector<1x1x5x128xf32>
    %1 = vector.shape_cast %0 : vector<1x1x5x128xf32> to vector<5x128xf32>
    %c0_3 = arith.constant 0 : index
    %c1 = arith.constant 1 : index
    %c0_4 = arith.constant 0 : index
    %c0_5 = arith.constant 0 : index
    %2 = vector.load %arg3[%c0_3, %c1, %c0_4, %c0_5] : memref<1x6x5x128xf32, #tpu.memory_space<vmem>>, vector<1x1x5x128xf32>
    %3 = vector.shape_cast %2 : vector<1x1x5x128xf32> to vector<5x128xf32>
    %c0_6 = arith.constant 0 : index
    %c2 = arith.constant 2 : index
    %c0_7 = arith.constant 0 : index
    %c0_8 = arith.constant 0 : index
    %4 = vector.load %arg3[%c0_6, %c2, %c0_7, %c0_8] : memref<1x6x5x128xf32, #tpu.memory_space<vmem>>, vector<1x1x5x128xf32>
    %5 = vector.shape_cast %4 : vector<1x1x5x128xf32> to vector<5x128xf32>
    %c0_9 = arith.constant 0 : index
    %c3 = arith.constant 3 : index
    %c0_10 = arith.constant 0 : index
    %c0_11 = arith.constant 0 : index
    %6 = vector.load %arg3[%c0_9, %c3, %c0_10, %c0_11] : memref<1x6x5x128xf32, #tpu.memory_space<vmem>>, vector<1x1x5x128xf32>
    %7 = vector.shape_cast %6 : vector<1x1x5x128xf32> to vector<5x128xf32>
    %c0_12 = arith.constant 0 : index
    %c4 = arith.constant 4 : index
    %c0_13 = arith.constant 0 : index
    %c0_14 = arith.constant 0 : index
    %8 = vector.load %arg3[%c0_12, %c4, %c0_13, %c0_14] : memref<1x6x5x128xf32, #tpu.memory_space<vmem>>, vector<1x1x5x128xf32>
    %9 = vector.shape_cast %8 : vector<1x1x5x128xf32> to vector<5x128xf32>
    %c0_15 = arith.constant 0 : index
    %c5 = arith.constant 5 : index
    %c0_16 = arith.constant 0 : index
    %c0_17 = arith.constant 0 : index
    %10 = vector.load %arg3[%c0_15, %c5, %c0_16, %c0_17] : memref<1x6x5x128xf32, #tpu.memory_space<vmem>>, vector<1x1x5x128xf32>
    %11 = vector.shape_cast %10 : vector<1x1x5x128xf32> to vector<5x128xf32>
    %c0_18 = arith.constant 0 : index
    %c0_19 = arith.constant 0 : index
    %c0_20 = arith.constant 0 : index
    %12 = vector.load %arg2[%c0_18, %c0_19, %c0_20] : memref<21x5x128xf32, #tpu.memory_space<vmem>>, vector<1x5x128xf32>
    %13 = vector.shape_cast %12 : vector<1x5x128xf32> to vector<5x128xf32>
    %14 = arith.mulf %13, %1 : vector<5x128xf32>
    %c1_21 = arith.constant 1 : index
    %c0_22 = arith.constant 0 : index
    %c0_23 = arith.constant 0 : index
    %15 = vector.load %arg2[%c1_21, %c0_22, %c0_23] : memref<21x5x128xf32, #tpu.memory_space<vmem>>, vector<1x5x128xf32>
    %16 = vector.shape_cast %15 : vector<1x5x128xf32> to vector<5x128xf32>
    %17 = arith.mulf %16, %3 : vector<5x128xf32>
    %18 = arith.addf %14, %17 : vector<5x128xf32>
    %c2_24 = arith.constant 2 : index
    %c0_25 = arith.constant 0 : index
    %c0_26 = arith.constant 0 : index
    %19 = vector.load %arg2[%c2_24, %c0_25, %c0_26] : memref<21x5x128xf32, #tpu.memory_space<vmem>>, vector<1x5x128xf32>
    %20 = vector.shape_cast %19 : vector<1x5x128xf32> to vector<5x128xf32>
    %21 = arith.mulf %20, %5 : vector<5x128xf32>
    %22 = arith.addf %18, %21 : vector<5x128xf32>
    %c3_27 = arith.constant 3 : index
    %c0_28 = arith.constant 0 : index
    %c0_29 = arith.constant 0 : index
    %23 = vector.load %arg2[%c3_27, %c0_28, %c0_29] : memref<21x5x128xf32, #tpu.memory_space<vmem>>, vector<1x5x128xf32>
    %24 = vector.shape_cast %23 : vector<1x5x128xf32> to vector<5x128xf32>
    %25 = arith.mulf %24, %7 : vector<5x128xf32>
    %26 = arith.addf %22, %25 : vector<5x128xf32>
    %c4_30 = arith.constant 4 : index
    %c0_31 = arith.constant 0 : index
    %c0_32 = arith.constant 0 : index
    %27 = vector.load %arg2[%c4_30, %c0_31, %c0_32] : memref<21x5x128xf32, #tpu.memory_space<vmem>>, vector<1x5x128xf32>
    %28 = vector.shape_cast %27 : vector<1x5x128xf32> to vector<5x128xf32>
    %29 = arith.mulf %28, %9 : vector<5x128xf32>
    %30 = arith.addf %26, %29 : vector<5x128xf32>
    %c5_33 = arith.constant 5 : index
    %c0_34 = arith.constant 0 : index
    %c0_35 = arith.constant 0 : index
    %31 = vector.load %arg2[%c5_33, %c0_34, %c0_35] : memref<21x5x128xf32, #tpu.memory_space<vmem>>, vector<1x5x128xf32>
    %32 = vector.shape_cast %31 : vector<1x5x128xf32> to vector<5x128xf32>
    %33 = arith.mulf %32, %11 : vector<5x128xf32>
    %34 = arith.addf %30, %33 : vector<5x128xf32>
    %c0_36 = arith.constant 0 : index
    %c0_37 = arith.constant 0 : index
    %c0_38 = arith.constant 0 : index
    %c0_39 = arith.constant 0 : index
    %35 = vector.load %arg4[%c0_36, %c0_37, %c0_38, %c0_39] : memref<1x6x5x128xf32, #tpu.memory_space<vmem>>, vector<1x1x5x128xf32>
    %36 = vector.shape_cast %35 : vector<1x1x5x128xf32> to vector<5x128xf32>
    %37 = vector.shape_cast %34 : vector<5x128xf32> to vector<1x1x5x128xf32>
    tpu.vector_store %arg4[%c0_36, %c0_37, %c0_38, %c0_39], %37 {strides = array<i32>} : memref<1x6x5x128xf32, #tpu.memory_space<vmem>>, vector<1x1x5x128xf32>,
    %c1_40 = arith.constant 1 : index
    %c0_41 = arith.constant 0 : index
    %c0_42 = arith.constant 0 : index
    %38 = vector.load %arg2[%c1_40, %c0_41, %c0_42] : memref<21x5x128xf32, #tpu.memory_space<vmem>>, vector<1x5x128xf32>
    %39 = vector.shape_cast %38 : vector<1x5x128xf32> to vector<5x128xf32>
    %40 = arith.mulf %39, %1 : vector<5x128xf32>
    %c6 = arith.constant 6 : index
    %c0_43 = arith.constant 0 : index
    %c0_44 = arith.constant 0 : index
    %41 = vector.load %arg2[%c6, %c0_43, %c0_44] : memref<21x5x128xf32, #tpu.memory_space<vmem>>, vector<1x5x128xf32>
    %42 = vector.shape_cast %41 : vector<1x5x128xf32> to vector<5x128xf32>
    %43 = arith.mulf %42, %3 : vector<5x128xf32>
    %44 = arith.addf %40, %43 : vector<5x128xf32>
    %c7 = arith.constant 7 : index
    %c0_45 = arith.constant 0 : index
    %c0_46 = arith.constant 0 : index
    %45 = vector.load %arg2[%c7, %c0_45, %c0_46] : memref<21x5x128xf32, #tpu.memory_space<vmem>>, vector<1x5x128xf32>
    %46 = vector.shape_cast %45 : vector<1x5x128xf32> to vector<5x128xf32>
    %47 = arith.mulf %46, %5 : vector<5x128xf32>
    %48 = arith.addf %44, %47 : vector<5x128xf32>
    %c8 = arith.constant 8 : index
    %c0_47 = arith.constant 0 : index
    %c0_48 = arith.constant 0 : index
    %49 = vector.load %arg2[%c8, %c0_47, %c0_48] : memref<21x5x128xf32, #tpu.memory_space<vmem>>, vector<1x5x128xf32>
    %50 = vector.shape_cast %49 : vector<1x5x128xf32> to vector<5x128xf32>
    %51 = arith.mulf %50, %7 : vector<5x128xf32>
    %52 = arith.addf %48, %51 : vector<5x128xf32>
    %c9 = arith.constant 9 : index
    %c0_49 = arith.constant 0 : index
    %c0_50 = arith.constant 0 : index
    %53 = vector.load %arg2[%c9, %c0_49, %c0_50] : memref<21x5x128xf32, #tpu.memory_space<vmem>>, vector<1x5x128xf32>
    %54 = vector.shape_cast %53 : vector<1x5x128xf32> to vector<5x128xf32>
    %55 = arith.mulf %54, %9 : vector<5x128xf32>
    %56 = arith.addf %52, %55 : vector<5x128xf32>
    %c10 = arith.constant 10 : index
    %c0_51 = arith.constant 0 : index
    %c0_52 = arith.constant 0 : index
    %57 = vector.load %arg2[%c10, %c0_51, %c0_52] : memref<21x5x128xf32, #tpu.memory_space<vmem>>, vector<1x5x128xf32>
    %58 = vector.shape_cast %57 : vector<1x5x128xf32> to vector<5x128xf32>
    %59 = arith.mulf %58, %11 : vector<5x128xf32>
    %60 = arith.addf %56, %59 : vector<5x128xf32>
    %c0_53 = arith.constant 0 : index
    %c1_54 = arith.constant 1 : index
    %c0_55 = arith.constant 0 : index
    %c0_56 = arith.constant 0 : index
    %61 = vector.load %arg4[%c0_53, %c1_54, %c0_55, %c0_56] : memref<1x6x5x128xf32, #tpu.memory_space<vmem>>, vector<1x1x5x128xf32>
    %62 = vector.shape_cast %61 : vector<1x1x5x128xf32> to vector<5x128xf32>
    %63 = vector.shape_cast %60 : vector<5x128xf32> to vector<1x1x5x128xf32>
    tpu.vector_store %arg4[%c0_53, %c1_54, %c0_55, %c0_56], %63 {strides = array<i32>} : memref<1x6x5x128xf32, #tpu.memory_space<vmem>>, vector<1x1x5x128xf32>,
    %c2_57 = arith.constant 2 : index
    %c0_58 = arith.constant 0 : index
    %c0_59 = arith.constant 0 : index
    %64 = vector.load %arg2[%c2_57, %c0_58, %c0_59] : memref<21x5x128xf32, #tpu.memory_space<vmem>>, vector<1x5x128xf32>
    %65 = vector.shape_cast %64 : vector<1x5x128xf32> to vector<5x128xf32>
    %66 = arith.mulf %65, %1 : vector<5x128xf32>
    %c7_60 = arith.constant 7 : index
    %c0_61 = arith.constant 0 : index
    %c0_62 = arith.constant 0 : index
    %67 = vector.load %arg2[%c7_60, %c0_61, %c0_62] : memref<21x5x128xf32, #tpu.memory_space<vmem>>, vector<1x5x128xf32>
    %68 = vector.shape_cast %67 : vector<1x5x128xf32> to vector<5x128xf32>
    %69 = arith.mulf %68, %3 : vector<5x128xf32>
    %70 = arith.addf %66, %69 : vector<5x128xf32>
    %c11 = arith.constant 11 : index
    %c0_63 = arith.constant 0 : index
    %c0_64 = arith.constant 0 : index
    %71 = vector.load %arg2[%c11, %c0_63, %c0_64] : memref<21x5x128xf32, #tpu.memory_space<vmem>>, vector<1x5x128xf32>
    %72 = vector.shape_cast %71 : vector<1x5x128xf32> to vector<5x128xf32>
    %73 = arith.mulf %72, %5 : vector<5x128xf32>
    %74 = arith.addf %70, %73 : vector<5x128xf32>
    %c12 = arith.constant 12 : index
    %c0_65 = arith.constant 0 : index
    %c0_66 = arith.constant 0 : index
    %75 = vector.load %arg2[%c12, %c0_65, %c0_66] : memref<21x5x128xf32, #tpu.memory_space<vmem>>, vector<1x5x128xf32>
    %76 = vector.shape_cast %75 : vector<1x5x128xf32> to vector<5x128xf32>
    %77 = arith.mulf %76, %7 : vector<5x128xf32>
    %78 = arith.addf %74, %77 : vector<5x128xf32>
    %c13 = arith.constant 13 : index
    %c0_67 = arith.constant 0 : index
    %c0_68 = arith.constant 0 : index
    %79 = vector.load %arg2[%c13, %c0_67, %c0_68] : memref<21x5x128xf32, #tpu.memory_space<vmem>>, vector<1x5x128xf32>
    %80 = vector.shape_cast %79 : vector<1x5x128xf32> to vector<5x128xf32>
    %81 = arith.mulf %80, %9 : vector<5x128xf32>
    %82 = arith.addf %78, %81 : vector<5x128xf32>
    %c14 = arith.constant 14 : index
    %c0_69 = arith.constant 0 : index
    %c0_70 = arith.constant 0 : index
    %83 = vector.load %arg2[%c14, %c0_69, %c0_70] : memref<21x5x128xf32, #tpu.memory_space<vmem>>, vector<1x5x128xf32>
    %84 = vector.shape_cast %83 : vector<1x5x128xf32> to vector<5x128xf32>
    %85 = arith.mulf %84, %11 : vector<5x128xf32>
    %86 = arith.addf %82, %85 : vector<5x128xf32>
    %c0_71 = arith.constant 0 : index
    %c2_72 = arith.constant 2 : index
    %c0_73 = arith.constant 0 : index
    %c0_74 = arith.constant 0 : index
    %87 = vector.load %arg4[%c0_71, %c2_72, %c0_73, %c0_74] : memref<1x6x5x128xf32, #tpu.memory_space<vmem>>, vector<1x1x5x128xf32>
    %88 = vector.shape_cast %87 : vector<1x1x5x128xf32> to vector<5x128xf32>
    %89 = vector.shape_cast %86 : vector<5x128xf32> to vector<1x1x5x128xf32>
    tpu.vector_store %arg4[%c0_71, %c2_72, %c0_73, %c0_74], %89 {strides = array<i32>} : memref<1x6x5x128xf32, #tpu.memory_space<vmem>>, vector<1x1x5x128xf32>,
    %c3_75 = arith.constant 3 : index
    %c0_76 = arith.constant 0 : index
    %c0_77 = arith.constant 0 : index
    %90 = vector.load %arg2[%c3_75, %c0_76, %c0_77] : memref<21x5x128xf32, #tpu.memory_space<vmem>>, vector<1x5x128xf32>
    %91 = vector.shape_cast %90 : vector<1x5x128xf32> to vector<5x128xf32>
    %92 = arith.mulf %91, %1 : vector<5x128xf32>
    %c8_78 = arith.constant 8 : index
    %c0_79 = arith.constant 0 : index
    %c0_80 = arith.constant 0 : index
    %93 = vector.load %arg2[%c8_78, %c0_79, %c0_80] : memref<21x5x128xf32, #tpu.memory_space<vmem>>, vector<1x5x128xf32>
    %94 = vector.shape_cast %93 : vector<1x5x128xf32> to vector<5x128xf32>
    %95 = arith.mulf %94, %3 : vector<5x128xf32>
    %96 = arith.addf %92, %95 : vector<5x128xf32>
    %c12_81 = arith.constant 12 : index
    %c0_82 = arith.constant 0 : index
    %c0_83 = arith.constant 0 : index
    %97 = vector.load %arg2[%c12_81, %c0_82, %c0_83] : memref<21x5x128xf32, #tpu.memory_space<vmem>>, vector<1x5x128xf32>
    %98 = vector.shape_cast %97 : vector<1x5x128xf32> to vector<5x128xf32>
    %99 = arith.mulf %98, %5 : vector<5x128xf32>
    %100 = arith.addf %96, %99 : vector<5x128xf32>
    %c15 = arith.constant 15 : index
    %c0_84 = arith.constant 0 : index
    %c0_85 = arith.constant 0 : index
    %101 = vector.load %arg2[%c15, %c0_84, %c0_85] : memref<21x5x128xf32, #tpu.memory_space<vmem>>, vector<1x5x128xf32>
    %102 = vector.shape_cast %101 : vector<1x5x128xf32> to vector<5x128xf32>
    %103 = arith.mulf %102, %7 : vector<5x128xf32>
    %104 = arith.addf %100, %103 : vector<5x128xf32>
    %c16 = arith.constant 16 : index
    %c0_86 = arith.constant 0 : index
    %c0_87 = arith.constant 0 : index
    %105 = vector.load %arg2[%c16, %c0_86, %c0_87] : memref<21x5x128xf32, #tpu.memory_space<vmem>>, vector<1x5x128xf32>
    %106 = vector.shape_cast %105 : vector<1x5x128xf32> to vector<5x128xf32>
    %107 = arith.mulf %106, %9 : vector<5x128xf32>
    %108 = arith.addf %104, %107 : vector<5x128xf32>
    %c17 = arith.constant 17 : index
    %c0_88 = arith.constant 0 : index
    %c0_89 = arith.constant 0 : index
    %109 = vector.load %arg2[%c17, %c0_88, %c0_89] : memref<21x5x128xf32, #tpu.memory_space<vmem>>, vector<1x5x128xf32>
    %110 = vector.shape_cast %109 : vector<1x5x128xf32> to vector<5x128xf32>
    %111 = arith.mulf %110, %11 : vector<5x128xf32>
    %112 = arith.addf %108, %111 : vector<5x128xf32>
    %c0_90 = arith.constant 0 : index
    %c3_91 = arith.constant 3 : index
    %c0_92 = arith.constant 0 : index
    %c0_93 = arith.constant 0 : index
    %113 = vector.load %arg4[%c0_90, %c3_91, %c0_92, %c0_93] : memref<1x6x5x128xf32, #tpu.memory_space<vmem>>, vector<1x1x5x128xf32>
    %114 = vector.shape_cast %113 : vector<1x1x5x128xf32> to vector<5x128xf32>
    %115 = vector.shape_cast %112 : vector<5x128xf32> to vector<1x1x5x128xf32>
    tpu.vector_store %arg4[%c0_90, %c3_91, %c0_92, %c0_93], %115 {strides = array<i32>} : memref<1x6x5x128xf32, #tpu.memory_space<vmem>>, vector<1x1x5x128xf32>,
    %c4_94 = arith.constant 4 : index
    %c0_95 = arith.constant 0 : index
    %c0_96 = arith.constant 0 : index
    %116 = vector.load %arg2[%c4_94, %c0_95, %c0_96] : memref<21x5x128xf32, #tpu.memory_space<vmem>>, vector<1x5x128xf32>
    %117 = vector.shape_cast %116 : vector<1x5x128xf32> to vector<5x128xf32>
    %118 = arith.mulf %117, %1 : vector<5x128xf32>
    %c9_97 = arith.constant 9 : index
    %c0_98 = arith.constant 0 : index
    %c0_99 = arith.constant 0 : index
    %119 = vector.load %arg2[%c9_97, %c0_98, %c0_99] : memref<21x5x128xf32, #tpu.memory_space<vmem>>, vector<1x5x128xf32>
    %120 = vector.shape_cast %119 : vector<1x5x128xf32> to vector<5x128xf32>
    %121 = arith.mulf %120, %3 : vector<5x128xf32>
    %122 = arith.addf %118, %121 : vector<5x128xf32>
    %c13_100 = arith.constant 13 : index
    %c0_101 = arith.constant 0 : index
    %c0_102 = arith.constant 0 : index
    %123 = vector.load %arg2[%c13_100, %c0_101, %c0_102] : memref<21x5x128xf32, #tpu.memory_space<vmem>>, vector<1x5x128xf32>
    %124 = vector.shape_cast %123 : vector<1x5x128xf32> to vector<5x128xf32>
    %125 = arith.mulf %124, %5 : vector<5x128xf32>
    %126 = arith.addf %122, %125 : vector<5x128xf32>
    %c16_103 = arith.constant 16 : index
    %c0_104 = arith.constant 0 : index
    %c0_105 = arith.constant 0 : index
    %127 = vector.load %arg2[%c16_103, %c0_104, %c0_105] : memref<21x5x128xf32, #tpu.memory_space<vmem>>, vector<1x5x128xf32>
    %128 = vector.shape_cast %127 : vector<1x5x128xf32> to vector<5x128xf32>
    %129 = arith.mulf %128, %7 : vector<5x128xf32>
    %130 = arith.addf %126, %129 : vector<5x128xf32>
    %c18 = arith.constant 18 : index
    %c0_106 = arith.constant 0 : index
    %c0_107 = arith.constant 0 : index
    %131 = vector.load %arg2[%c18, %c0_106, %c0_107] : memref<21x5x128xf32, #tpu.memory_space<vmem>>, vector<1x5x128xf32>
    %132 = vector.shape_cast %131 : vector<1x5x128xf32> to vector<5x128xf32>
    %133 = arith.mulf %132, %9 : vector<5x128xf32>
    %134 = arith.addf %130, %133 : vector<5x128xf32>
    %c19 = arith.constant 19 : index
    %c0_108 = arith.constant 0 : index
    %c0_109 = arith.constant 0 : index
    %135 = vector.load %arg2[%c19, %c0_108, %c0_109] : memref<21x5x128xf32, #tpu.memory_space<vmem>>, vector<1x5x128xf32>
    %136 = vector.shape_cast %135 : vector<1x5x128xf32> to vector<5x128xf32>
    %137 = arith.mulf %136, %11 : vector<5x128xf32>
    %138 = arith.addf %134, %137 : vector<5x128xf32>
    %c0_110 = arith.constant 0 : index
    %c4_111 = arith.constant 4 : index
    %c0_112 = arith.constant 0 : index
    %c0_113 = arith.constant 0 : index
    %139 = vector.load %arg4[%c0_110, %c4_111, %c0_112, %c0_113] : memref<1x6x5x128xf32, #tpu.memory_space<vmem>>, vector<1x1x5x128xf32>
    %140 = vector.shape_cast %139 : vector<1x1x5x128xf32> to vector<5x128xf32>
    %141 = vector.shape_cast %138 : vector<5x128xf32> to vector<1x1x5x128xf32>
    tpu.vector_store %arg4[%c0_110, %c4_111, %c0_112, %c0_113], %141 {strides = array<i32>} : memref<1x6x5x128xf32, #tpu.memory_space<vmem>>, vector<1x1x5x128xf32>,
    %c5_114 = arith.constant 5 : index
    %c0_115 = arith.constant 0 : index
    %c0_116 = arith.constant 0 : index
    %142 = vector.load %arg2[%c5_114, %c0_115, %c0_116] : memref<21x5x128xf32, #tpu.memory_space<vmem>>, vector<1x5x128xf32>
    %143 = vector.shape_cast %142 : vector<1x5x128xf32> to vector<5x128xf32>
    %144 = arith.mulf %143, %1 : vector<5x128xf32>
    %c10_117 = arith.constant 10 : index
    %c0_118 = arith.constant 0 : index
    %c0_119 = arith.constant 0 : index
    %145 = vector.load %arg2[%c10_117, %c0_118, %c0_119] : memref<21x5x128xf32, #tpu.memory_space<vmem>>, vector<1x5x128xf32>
    %146 = vector.shape_cast %145 : vector<1x5x128xf32> to vector<5x128xf32>
    %147 = arith.mulf %146, %3 : vector<5x128xf32>
    %148 = arith.addf %144, %147 : vector<5x128xf32>
    %c14_120 = arith.constant 14 : index
    %c0_121 = arith.constant 0 : index
    %c0_122 = arith.constant 0 : index
    %149 = vector.load %arg2[%c14_120, %c0_121, %c0_122] : memref<21x5x128xf32, #tpu.memory_space<vmem>>, vector<1x5x128xf32>
    %150 = vector.shape_cast %149 : vector<1x5x128xf32> to vector<5x128xf32>
    %151 = arith.mulf %150, %5 : vector<5x128xf32>
    %152 = arith.addf %148, %151 : vector<5x128xf32>
    %c17_123 = arith.constant 17 : index
    %c0_124 = arith.constant 0 : index
    %c0_125 = arith.constant 0 : index
    %153 = vector.load %arg2[%c17_123, %c0_124, %c0_125] : memref<21x5x128xf32, #tpu.memory_space<vmem>>, vector<1x5x128xf32>
    %154 = vector.shape_cast %153 : vector<1x5x128xf32> to vector<5x128xf32>
    %155 = arith.mulf %154, %7 : vector<5x128xf32>
    %156 = arith.addf %152, %155 : vector<5x128xf32>
    %c19_126 = arith.constant 19 : index
    %c0_127 = arith.constant 0 : index
    %c0_128 = arith.constant 0 : index
    %157 = vector.load %arg2[%c19_126, %c0_127, %c0_128] : memref<21x5x128xf32, #tpu.memory_space<vmem>>, vector<1x5x128xf32>
    %158 = vector.shape_cast %157 : vector<1x5x128xf32> to vector<5x128xf32>
    %159 = arith.mulf %158, %9 : vector<5x128xf32>
    %160 = arith.addf %156, %159 : vector<5x128xf32>
    %c20 = arith.constant 20 : index
    %c0_129 = arith.constant 0 : index
    %c0_130 = arith.constant 0 : index
    %161 = vector.load %arg2[%c20, %c0_129, %c0_130] : memref<21x5x128xf32, #tpu.memory_space<vmem>>, vector<1x5x128xf32>
    %162 = vector.shape_cast %161 : vector<1x5x128xf32> to vector<5x128xf32>
    %163 = arith.mulf %162, %11 : vector<5x128xf32>
    %164 = arith.addf %160, %163 : vector<5x128xf32>
    %c0_131 = arith.constant 0 : index
    %c5_132 = arith.constant 5 : index
    %c0_133 = arith.constant 0 : index
    %c0_134 = arith.constant 0 : index
    %165 = vector.load %arg4[%c0_131, %c5_132, %c0_133, %c0_134] : memref<1x6x5x128xf32, #tpu.memory_space<vmem>>, vector<1x1x5x128xf32>
    %166 = vector.shape_cast %165 : vector<1x1x5x128xf32> to vector<5x128xf32>
    %167 = vector.shape_cast %164 : vector<5x128xf32> to vector<1x1x5x128xf32>
    tpu.vector_store %arg4[%c0_131, %c5_132, %c0_133, %c0_134], %167 {strides = array<i32>} : memref<1x6x5x128xf32, #tpu.memory_space<vmem>>, vector<1x1x5x128xf32>,
    return
  }
  func.func @transform_0(%arg0: i32, %arg1: i32) -> (i32, i32, i32) {
    %c0_i32 = arith.constant 0 : i32
    %c0_i32_0 = arith.constant 0 : i32
    %c0_i32_1 = arith.constant 0 : i32
    return %c0_i32, %arg0, %c0_i32_0 : i32, i32, i32
  }
  func.func @transform_1(%arg0: i32, %arg1: i32) -> (i32, i32, i32, i32) {
    %c0_i32 = arith.constant 0 : i32
    %c0_i32_0 = arith.constant 0 : i32
    %c0_i32_1 = arith.constant 0 : i32
    return %arg1, %c0_i32, %arg0, %c0_i32_0 : i32, i32, i32, i32
  }
  func.func @transform_2(%arg0: i32, %arg1: i32) -> (i32, i32, i32, i32) {
    %c0_i32 = arith.constant 0 : i32
    %c0_i32_0 = arith.constant 0 : i32
    %c0_i32_1 = arith.constant 0 : i32
    return %arg1, %c0_i32, %arg0, %c0_i32_0 : i32, i32, i32, i32
  }
}

</mosaic_0001>

<bundles_post_ra>
// kernel: greens_op_forward.2
= control target key start
LH: loop header
LB: loop body
LE: loop exit
PB: predicated region body
PF: predicated region fallthrough
CT: control target
= control target key end

     0   :  { %s571_s9 = smov 0   ;;  %s573_s10 = smov 0   ;;  %s709_s0 = inlined_call_operand.vmem [shape: f32[2,21,4,128], index: 0, kind: input, shape index: {}]   ;;  %s710_s1 = inlined_call_operand.vmem [shape: f32[2,6,4,128], index: 1, kind: input, shape index: {}]   ;;  %s711_s2 = inlined_call_operand.vmem [shape: f32[2,6,4,128], index: 2, kind: output, shape index: {}]  }
   0x1   :  { %s575_s11 = smov 0  }
   0x2 LB: > { %s21_s12 = sadd.s32 1, %s550_s10  ;;  %p455_p0 = scmp.ge.s32.totalorder %s554_s11, 1  ;;  %s554_s11 = sphi %s575_s11, %s12_s11   ;;  %s550_s10 = sphi %s573_s10, %s713_s10   ;;  %s546_s9 = sphi %s571_s9, %s712_s9  }
   0x3   : > { %p22_p1 = scmp.ge.s32.totalorder %s21_s12, 2  ;;  %p146_p2 = scmp.lt.s32.totalorder %s554_s11, 3 }
   0x5   : > { %s715_s12 = smov (%p22_p1, %s21_s12), 0  ;;  %p147_p3 = pnand %p455_p0, %p146_p2 }
   0x6   : > { %p182_p4 = scmp.lt.s32.totalorder (!%p147_p3), %s546_s9, 1 }
   0x7   : > { %150 = sbr.rel (%p147_p3) target bundleno = 45 (0x2d), region = 28 }
   0xe   : > { %s717_s9 = smov (!%p182_p4, %s546_s9), 1 }
   0xf   : > { %s506_s13 = smul.u32 84, %s717_s9 }
  0x10   : > { %s507_s14 = smul.u32 24, %s717_s9 }
  0x11   : > { %s596_s17 = scalar_lea.vmem %s709_s0, %s506_s13 }
  0x12   : > { %s197_s20 = scalar_lea.vmem %s710_s1, %s507_s14  ;;  %v217_v0 = vld [vmem:[%s596_s17] sm:$0xf]  ;;  %v464_v1 = vld [vmem:[%s596_s17 + $0x4] sm:$0xf]  ;;  %v465_v2 = vld [vmem:[%s596_s17 + $0x8] sm:$0xf]  ;;  %s667_s23 = scalar_lea.vmem %s711_s2, %s507_s14 }
  0x13   : > { %v606_v3 = vld [vmem:[%s197_s20] sm:$0xf]  ;;  %v608_v4 = vld [vmem:[%s197_s20 + $0x4] sm:$0xf]  ;;  %v610_v5 = vld [vmem:[%s197_s20 + $0x8] sm:$0xf] }
  0x14   : > { %v612_v6 = vld [vmem:[%s197_s20 + $0xc] sm:$0xf]  ;;  %v614_v7 = vld [vmem:[%s197_s20 + $0x10] sm:$0xf]  ;;  %v616_v8 = vld [vmem:[%s197_s20 + $0x14] sm:$0xf]  ;;  %v218_v9 = vmul.f32 %v217_v0, %v606_v3  ;;  %v221_v10 = vmul.f32 %v464_v1, %v608_v4  ;;  %v225_v11 = vmul.f32 %v465_v2, %v610_v5 }
  0x15   : > { %v466_v12 = vld [vmem:[%s596_s17 + $0xc] sm:$0xf]  ;;  %v467_v13 = vld [vmem:[%s596_s17 + $0x10] sm:$0xf]  ;;  %v468_v14 = vld [vmem:[%s596_s17 + $0x14] sm:$0xf] }
  0x16   : > { %v222_v15 = vadd.f32 %v221_v10, %v218_v9  ;;  %v229_v16 = vmul.f32 %v466_v12, %v612_v6  ;;  %v469_v17 = vld [vmem:[%s596_s17 + $0x4] sm:$0xf]  ;;  %v470_v18 = vld [vmem:[%s596_s17 + $0x18] sm:$0xf]  ;;  %v471_v19 = vld [vmem:[%s596_s17 + $0x1c] sm:$0xf]  ;;  %v233_v27 = vmul.f32 %v467_v13, %v614_v7  ;;  %v237_v28 = vmul.f32 %v468_v14, %v616_v8 }
  0x17   : > { %v241_v20 = vmul.f32 %v469_v17, %v606_v3  ;;  %v244_v21 = vmul.f32 %v470_v18, %v608_v4  ;;  %v248_v22 = vmul.f32 %v471_v19, %v610_v5  ;;  %v472_v23 = vld [vmem:[%s596_s17 + $0x20] sm:$0xf]  ;;  %v473_v24 = vld [vmem:[%s596_s17 + $0x24] sm:$0xf]  ;;  %v474_v25 = vld [vmem:[%s596_s17 + $0x28] sm:$0xf] }
  0x18   : > { %v226_v26 = vadd.f32 %v225_v11, %v222_v15  ;;  %v252_v29 = vmul.f32 %v472_v23, %v612_v6  ;;  %v476_v30 = vld [vmem:[%s596_s17 + $0x8] sm:$0xf]  ;;  %v477_v31 = vld [vmem:[%s596_s17 + $0x1c] sm:$0xf]  ;;  %v478_v32 = vld [vmem:[%s596_s17 + $0x2c] sm:$0xf]  ;;  %v256_v41 = vmul.f32 %v473_v24, %v614_v7  ;;  %v260_v42 = vmul.f32 %v474_v25, %v616_v8 }
  0x19   : > { %v245_v33 = vadd.f32 %v244_v21, %v241_v20  ;;  %v265_v34 = vmul.f32 %v476_v30, %v606_v3  ;;  %v267_v35 = vmul.f32 %v477_v31, %v608_v4  ;;  %v271_v36 = vmul.f32 %v478_v32, %v610_v5  ;;  %v479_v37 = vld [vmem:[%s596_s17 + $0x30] sm:$0xf]  ;;  %v480_v38 = vld [vmem:[%s596_s17 + $0x34] sm:$0xf]  ;;  %v481_v39 = vld [vmem:[%s596_s17 + $0x38] sm:$0xf] }
  0x1a   : > { %v230_v40 = vadd.f32 %v229_v16, %v226_v26  ;;  %v275_v43 = vmul.f32 %v479_v37, %v612_v6  ;;  %v483_v44 = vld [vmem:[%s596_s17 + $0xc] sm:$0xf]  ;;  %v484_v45 = vld [vmem:[%s596_s17 + $0x20] sm:$0xf]  ;;  %v485_v46 = vld [vmem:[%s596_s17 + $0x30] sm:$0xf]  ;;  %v279_v54 = vmul.f32 %v480_v38, %v614_v7  ;;  %v283_v55 = vmul.f32 %v481_v39, %v616_v8 }
  0x1b   : > { %v249_v47 = vadd.f32 %v248_v22, %v245_v33  ;;  %v268_v48 = vadd.f32 %v267_v35, %v265_v34  ;;  %v288_v49 = vmul.f32 %v483_v44, %v606_v3  ;;  %v290_v50 = vmul.f32 %v484_v45, %v608_v4  ;;  %v486_v51 = vld [vmem:[%s596_s17 + $0x3c] sm:$0xf]  ;;  %v487_v52 = vld [vmem:[%s596_s17 + $0x40] sm:$0xf]  ;;  %v490_v57 = vld [vmem:[%s596_s17 + $0x10] sm:$0xf] }
  0x1c   : > { %v234_v53 = vadd.f32 %v233_v27, %v230_v40  ;;  %v293_v56 = vmul.f32 %v485_v46, %v610_v5  ;;  %v491_v58 = vld [vmem:[%s596_s17 + $0x24] sm:$0xf]  ;;  %v492_v59 = vld [vmem:[%s596_s17 + $0x34] sm:$0xf]  ;;  %v297_v63 = vmul.f32 %v486_v51, %v612_v6  ;;  %v493_v1 = vld [vmem:[%s596_s17 + $0x40] sm:$0xf]  ;;  %v310_v9 = vmul.f32 %v490_v57, %v606_v3 }
  0x1d   : > { %v253_v60 = vadd.f32 %v252_v29, %v249_v47  ;;  %v272_v61 = vadd.f32 %v271_v36, %v268_v48  ;;  %v291_v62 = vadd.f32 %v290_v50, %v288_v49  ;;  %v488_v0 = vld [vmem:[%s596_s17 + $0x44] sm:$0xf]  ;;  %v312_v10 = vmul.f32 %v491_v58, %v608_v4  ;;  %v497_v12 = vld [vmem:[%s596_s17 + $0x14] sm:$0xf]  ;;  %v498_v13 = vld [vmem:[%s596_s17 + $0x28] sm:$0xf] }
  0x1e   : > { %v238_v2 = vadd.f32 %v237_v28, %v234_v53  ;;  %v315_v11 = vmul.f32 %v492_v59, %v610_v5  ;;  %v301_v17 = vmul.f32 %v487_v52, %v614_v7  ;;  %v494_v18 = vld [vmem:[%s596_s17 + $0x48] sm:$0xf]  ;;  %v499_v19 = vld [vmem:[%s596_s17 + $0x38] sm:$0xf]  ;;  %v305_v20 = vmul.f32 %v488_v0, %v616_v8  ;;  %v500_v24 = vld [vmem:[%s596_s17 + $0x44] sm:$0xf] }
  0x1f   : > { %v257_v14 = vadd.f32 %v256_v41, %v253_v60  ;;  %v276_v15 = vadd.f32 %v275_v43, %v272_v61  ;;  %v294_v16 = vadd.f32 %v293_v56, %v291_v62  ;;  %v313_v21 = vadd.f32 %v312_v10, %v310_v9  ;;  %v495_v28 = vld [vmem:[%s596_s17 + $0x4c] sm:$0xf]  ;;  %v502_v39 = vld [vmem:[%s596_s17 + $0x50] sm:$0xf] }
  0x20   : > { %239 = vst [vmem:[%s667_s23] sm:$0xf] %v238_v2  ;;  %v318_v22 = vmul.f32 %v493_v1, %v612_v6  ;;  %v331_v23 = vmul.f32 %v497_v12, %v606_v3  ;;  %v333_v29 = vmul.f32 %v498_v13, %v608_v4  ;;  %v322_v31 = vmul.f32 %v494_v18, %v614_v7  ;;  %v501_v33 = vld [vmem:[%s596_s17 + $0x4c] sm:$0xf] }
  0x21   : > { %v261_v25 = vadd.f32 %v260_v42, %v257_v14  ;;  %v280_v26 = vadd.f32 %v279_v54, %v276_v15  ;;  %v298_v27 = vadd.f32 %v297_v63, %v294_v16  ;;  %v316_v30 = vadd.f32 %v315_v11, %v313_v21 }
  0x22   : > { %v336_v32 = vmul.f32 %v499_v19, %v610_v5  ;;  %v334_v3 = vadd.f32 %v333_v29, %v331_v23  ;;  %v339_v36 = vmul.f32 %v500_v24, %v612_v6  ;;  %v326_v38 = vmul.f32 %v495_v28, %v616_v8 }
  0x23   : > { %475 = vst [vmem:[%s667_s23 + $0x4] sm:$0xf] %v261_v25  ;;  %v284_v34 = vadd.f32 %v283_v55, %v280_v26  ;;  %v302_v35 = vadd.f32 %v301_v17, %v298_v27  ;;  %v319_v37 = vadd.f32 %v318_v22, %v316_v30  ;;  %v342_v41 = vmul.f32 %v501_v33, %v614_v7 }
  0x24   : > { %v337_v40 = vadd.f32 %v336_v32, %v334_v3  ;;  %v346_v43 = vmul.f32 %v502_v39, %v616_v8 }
  0x25   : > { %482 = vst [vmem:[%s667_s23 + $0x8] sm:$0xf] %v284_v34  ;;  %v306_v4 = vadd.f32 %v305_v20, %v302_v35  ;;  %v323_v42 = vadd.f32 %v322_v31, %v319_v37 }
  0x26   : > { %v340_v5 = vadd.f32 %v339_v36, %v337_v40 }
  0x27   : > { %489 = vst [vmem:[%s667_s23 + $0xc] sm:$0xf] %v306_v4  ;;  %v327_v44 = vadd.f32 %v326_v38, %v323_v42 }
  0x28   : > { %v343_v45 = vadd.f32 %v342_v41, %v340_v5 }
  0x29   : > { %496 = vst [vmem:[%s667_s23 + $0x10] sm:$0xf] %v327_v44 }
  0x2a   : > { %v347_v46 = vadd.f32 %v346_v43, %v343_v45 }
  0x2c   : > { %503 = vst [vmem:[%s667_s23 + $0x14] sm:$0xf] %v347_v46 }
  0x2d PF: > { %s12_s11 = sadd.s32 1, %s554_s11   ;;  %s712_s9 = smov %s550_s10 }
  0x2e   : > { %p9_p5 = scmp.ge.s32.totalorder %s12_s11, 4   ;;  %s713_s10 = smov %s715_s12 }
  0x30   :  { %11 = sbr.rel (!%p9_p5) target bundleno = 2 (0x2), region = 91 }

// kernel: greens_op_forward.3
= control target key start
LH: loop header
LB: loop body
LE: loop exit
PB: predicated region body
PF: predicated region fallthrough
CT: control target
= control target key end

     0   :  { %s554_s9 = smov 0   ;;  %s556_s10 = smov 0   ;;  %s758_s0 = inlined_call_operand.vmem [shape: f32[21,5,128], index: 0, kind: input, shape index: {}]   ;;  %s759_s1 = inlined_call_operand.vmem [shape: f32[2,6,5,128], index: 1, kind: input, shape index: {}]   ;;  %s760_s2 = inlined_call_operand.vmem [shape: f32[2,6,5,128], index: 2, kind: output, shape index: {}]  }
   0x1   :  { %s558_s11 = smov 0  }
   0x2 LB: > { %s21_s12 = sadd.s32 1, %s533_s10  ;;  %p440_p0 = scmp.ge.s32.totalorder %s537_s11, 1  ;;  %s537_s11 = sphi %s558_s11, %s12_s11   ;;  %s533_s10 = sphi %s556_s10, %s762_s10   ;;  %s529_s9 = sphi %s554_s9, %s761_s9  }
   0x3   : > { %p22_p1 = scmp.ge.s32.totalorder %s21_s12, 2  ;;  %p140_p2 = scmp.lt.s32.totalorder %s537_s11, 3 }
   0x5   : > { %s764_s12 = smov (%p22_p1, %s21_s12), 0  ;;  %p141_p3 = pnand %p440_p0, %p140_p2 }
   0x6   : > { %p176_p4 = scmp.lt.s32.totalorder (!%p141_p3), %s529_s9, 1  ;;  %v203_v0 = vld [vmem:[%s758_s0] sm:$0x1f] (!%p141_p3)  ;;  %v448_v1 = vld [vmem:[%s758_s0 + $0x8] sm:$0x1f] (!%p141_p3) }
   0x7   : > { %144 = sbr.rel (%p141_p3) target bundleno = 43 (0x2b), region = 28  ;;  %v449_v2 = vld [vmem:[%s758_s0 + $0x10] sm:$0x1f] (!%p141_p3)  ;;  %v450_v3 = vld [vmem:[%s758_s0 + $0x18] sm:$0x1f] (!%p141_p3) }
   0x8   : > { %v451_v4 = vld [vmem:[%s758_s0 + $0x20] sm:$0x1f] (!%p141_p3)  ;;  %v453_v5 = vld [vmem:[%s758_s0 + $0x8] sm:$0x1f] (!%p141_p3)  ;;  %v454_v7 = vld [vmem:[%s758_s0 + $0x30] sm:$0x1f] (!%p141_p3) }
   0x9   : > { %v452_v6 = vld [vmem:[%s758_s0 + $0x28] sm:$0x1f] (!%p141_p3)  ;;  %v455_v8 = vld [vmem:[%s758_s0 + $0x38] sm:$0x1f] (!%p141_p3)  ;;  %v456_v9 = vld [vmem:[%s758_s0 + $0x40] sm:$0x1f] (!%p141_p3) }
   0xa   : > { %v457_v10 = vld [vmem:[%s758_s0 + $0x48] sm:$0x1f] (!%p141_p3)  ;;  %v460_v11 = vld [vmem:[%s758_s0 + $0x10] sm:$0x1f] (!%p141_p3)  ;;  %v461_v12 = vld [vmem:[%s758_s0 + $0x38] sm:$0x1f] (!%p141_p3) }
   0xb   : > { %v458_v26 = vld [vmem:[%s758_s0 + $0x50] sm:$0x1f] (!%p141_p3)  ;;  %v462_v27 = vld [vmem:[%s758_s0 + $0x58] sm:$0x1f] (!%p141_p3)  ;;  %v463_v28 = vld [vmem:[%s758_s0 + $0x60] sm:$0x1f] (!%p141_p3) }
   0xc   : > { %v464_v33 = vld [vmem:[%s758_s0 + $0x68] sm:$0x1f] (!%p141_p3)  ;;  %v467_v34 = vld [vmem:[%s758_s0 + $0x18] sm:$0x1f] (!%p141_p3)  ;;  %v465_v39 = vld [vmem:[%s758_s0 + $0x70] sm:$0x1f] (!%p141_p3) }
   0xd   : > { %v468_v40 = vld [vmem:[%s758_s0 + $0x40] sm:$0x1f] (!%p141_p3)  ;;  %v470_v46 = vld [vmem:[%s758_s0 + $0x78] sm:$0x1f] (!%p141_p3)  ;;  %v475_v53 = vld [vmem:[%s758_s0 + $0x48] sm:$0x1f] (!%p141_p3) }
   0xe   : > { %s766_s9 = smov (!%p176_p4, %s529_s9), 1  ;;  %v469_v41 = vld [vmem:[%s758_s0 + $0x60] sm:$0x1f]  ;;  %v472_v58 = vld [vmem:[%s758_s0 + $0x88] sm:$0x1f] }
   0xf   : > { %s490_s19 = smul.u32 48, %s766_s9  ;;  %v471_v47 = vld [vmem:[%s758_s0 + $0x80] sm:$0x1f]  ;;  %v476_v59 = vld [vmem:[%s758_s0 + $0x68] sm:$0x1f] }
  0x10   : > { %v474_v52 = vld [vmem:[%s758_s0 + $0x20] sm:$0x1f] }
  0x11   : > { %s183_s8 = scalar_lea.vmem %s759_s1, %s490_s19  ;;  %s712_s5 = scalar_lea.vmem %s760_s2, %s490_s19 }
  0x12   : > { %v619_v13 = vld [vmem:[%s183_s8] sm:$0x1f]  ;;  %v621_v14 = vld [vmem:[%s183_s8 + $0x8] sm:$0x1f]  ;;  %v623_v15 = vld [vmem:[%s183_s8 + $0x10] sm:$0x1f] }
  0x13   : > { %v625_v16 = vld [vmem:[%s183_s8 + $0x18] sm:$0x1f]  ;;  %v627_v17 = vld [vmem:[%s183_s8 + $0x20] sm:$0x1f]  ;;  %v629_v18 = vld [vmem:[%s183_s8 + $0x28] sm:$0x1f]  ;;  %v204_v19 = vmul.f32 %v203_v0, %v619_v13  ;;  %v207_v20 = vmul.f32 %v448_v1, %v621_v14  ;;  %v211_v21 = vmul.f32 %v449_v2, %v623_v15  ;;  %v227_v22 = vmul.f32 %v453_v5, %v619_v13 }
  0x14   : > { %v215_v23 = vmul.f32 %v450_v3, %v625_v16  ;;  %v219_v24 = vmul.f32 %v451_v4, %v627_v17  ;;  %v230_v25 = vmul.f32 %v454_v7, %v621_v14  ;;  %v223_v30 = vmul.f32 %v452_v6, %v629_v18  ;;  %v477_v0 = vld [vmem:[%s758_s0 + $0x80] sm:$0x1f]  ;;  %v478_v5 = vld [vmem:[%s758_s0 + $0x90] sm:$0x1f]  ;;  %v481_v6 = vld [vmem:[%s758_s0 + $0x28] sm:$0x1f] }
  0x15   : > { %v208_v29 = vadd.f32 %v207_v20, %v204_v19  ;;  %v234_v31 = vmul.f32 %v455_v8, %v623_v15  ;;  %v238_v32 = vmul.f32 %v456_v9, %v625_v16  ;;  %v242_v36 = vmul.f32 %v457_v10, %v627_v17 }
  0x16   : > { %v231_v35 = vadd.f32 %v230_v25, %v227_v22  ;;  %v251_v37 = vmul.f32 %v460_v11, %v619_v13  ;;  %v253_v38 = vmul.f32 %v461_v12, %v621_v14  ;;  %v246_v43 = vmul.f32 %v458_v26, %v629_v18  ;;  %v482_v11 = vld [vmem:[%s758_s0 + $0x50] sm:$0x1f] }
  0x17   : > { %v212_v42 = vadd.f32 %v211_v21, %v208_v29  ;;  %v257_v44 = vmul.f32 %v462_v27, %v623_v15  ;;  %v261_v45 = vmul.f32 %v463_v28, %v625_v16  ;;  %v265_v50 = vmul.f32 %v464_v33, %v627_v17  ;;  %v483_v12 = vld [vmem:[%s758_s0 + $0x70] sm:$0x1f]  ;;  %v484_v28 = vld [vmem:[%s758_s0 + $0x88] sm:$0x1f] }
  0x18   : > { %v235_v48 = vadd.f32 %v234_v31, %v231_v35  ;;  %v254_v49 = vadd.f32 %v253_v38, %v251_v37  ;;  %v274_v51 = vmul.f32 %v467_v34, %v619_v13  ;;  %v269_v55 = vmul.f32 %v465_v39, %v629_v18 }
  0x19   : > { %v216_v54 = vadd.f32 %v215_v23, %v212_v42  ;;  %v276_v56 = vmul.f32 %v468_v40, %v621_v14  ;;  %v279_v57 = vmul.f32 %v469_v41, %v623_v15  ;;  %v283_v62 = vmul.f32 %v470_v46, %v625_v16  ;;  %v479_v23 = vld [vmem:[%s758_s0 + $0x98] sm:$0x1f] }
  0x1a   : > { %v239_v60 = vadd.f32 %v238_v32, %v235_v48  ;;  %v258_v61 = vadd.f32 %v257_v44, %v254_v49  ;;  %v287_v63 = vmul.f32 %v471_v47, %v627_v17  ;;  %v296_v3 = vmul.f32 %v474_v52, %v619_v13 }
  0x1b   : > { %v220_v1 = vadd.f32 %v219_v24, %v216_v54  ;;  %v277_v2 = vadd.f32 %v276_v56, %v274_v51  ;;  %v298_v4 = vmul.f32 %v475_v53, %v621_v14  ;;  %v291_v9 = vmul.f32 %v472_v58, %v629_v18 }
  0x1c   : > { %v243_v7 = vadd.f32 %v242_v36, %v239_v60  ;;  %v262_v8 = vadd.f32 %v261_v45, %v258_v61  ;;  %v301_v10 = vmul.f32 %v476_v59, %v623_v15  ;;  %v304_v22 = vmul.f32 %v477_v0, %v625_v16 }
  0x1d   : > { %v224_v19 = vadd.f32 %v223_v30, %v220_v1  ;;  %v280_v20 = vadd.f32 %v279_v57, %v277_v2  ;;  %v299_v21 = vadd.f32 %v298_v4, %v296_v3  ;;  %v308_v26 = vmul.f32 %v478_v5, %v627_v17 }
  0x1e   : > { %v247_v24 = vadd.f32 %v246_v43, %v243_v7  ;;  %v266_v25 = vadd.f32 %v265_v50, %v262_v8  ;;  %v317_v27 = vmul.f32 %v481_v6, %v619_v13  ;;  %v319_v31 = vmul.f32 %v482_v11, %v621_v14  ;;  %v485_v13 = vld [vmem:[%s758_s0 + $0x98] sm:$0x1f]  ;;  %v486_v14 = vld [vmem:[%s758_s0 + $0xa0] sm:$0x1f] }
  0x1f   : > { %225 = vst [vmem:[%s712_s5] sm:$0x1f] %v224_v19  ;;  %v284_v29 = vadd.f32 %v283_v62, %v280_v20  ;;  %v302_v30 = vadd.f32 %v301_v10, %v299_v21  ;;  %v322_v32 = vmul.f32 %v483_v12, %v623_v15  ;;  %v312_v34 = vmul.f32 %v479_v23, %v629_v18 }
  0x20   : > { %459 = vst [vmem:[%s712_s5 + $0x8] sm:$0x1f] %v247_v24  ;;  %v270_v33 = vadd.f32 %v269_v55, %v266_v25  ;;  %v320_v37 = vadd.f32 %v319_v31, %v317_v27  ;;  %v325_v38 = vmul.f32 %v484_v28, %v625_v16  ;;  %v328_v41 = vmul.f32 %v485_v13, %v627_v17 }
  0x21   : > { %v288_v35 = vadd.f32 %v287_v63, %v284_v29  ;;  %v305_v36 = vadd.f32 %v304_v22, %v302_v30  ;;  %v332_v44 = vmul.f32 %v486_v14, %v629_v18 }
  0x22   : > { %466 = vst [vmem:[%s712_s5 + $0x10] sm:$0x1f] %v270_v33  ;;  %v323_v40 = vadd.f32 %v322_v32, %v320_v37 }
  0x23   : > { %v292_v15 = vadd.f32 %v291_v9, %v288_v35  ;;  %v309_v39 = vadd.f32 %v308_v26, %v305_v36 }
  0x24   : > { %v326_v43 = vadd.f32 %v325_v38, %v323_v40 }
  0x25   : > { %473 = vst [vmem:[%s712_s5 + $0x18] sm:$0x1f] %v292_v15  ;;  %v313_v42 = vadd.f32 %v312_v34, %v309_v39 }
  0x26   : > { %v329_v45 = vadd.f32 %v328_v41, %v326_v43 }
  0x27   : > { %480 = vst [vmem:[%s712_s5 + $0x20] sm:$0x1f] %v313_v42 }
  0x28   : > { %v333_v46 = vadd.f32 %v332_v44, %v329_v45 }
  0x2a   : > { %487 = vst [vmem:[%s712_s5 + $0x28] sm:$0x1f] %v333_v46 }
  0x2b PF: > { %s12_s11 = sadd.s32 1, %s537_s11   ;;  %s761_s9 = smov %s533_s10 }
  0x2c   : > { %p9_p5 = scmp.ge.s32.totalorder %s12_s11, 4   ;;  %s762_s10 = smov %s764_s12 }
  0x2e   :  { %11 = sbr.rel (!%p9_p5) target bundleno = 2 (0x2), region = 91 }

// kernel: reverse.1
= control target key start
LH: loop header
LB: loop body
LE: loop exit
PB: predicated region body
PF: predicated region fallthrough
CT: control target
= control target key end

     0   :  { %s440_s0 = inlined_call_operand.vmem [shape: f32[2,6,8,8,3], index: 0, kind: input, shape index: {}]   ;;  %s441_s1 = inlined_call_operand.vmem [shape: f32[2,6,8,8,3], index: 1, kind: output, shape index: {}]  }
   0x1   :  { %v144_v0 = vld [vmem:[%s440_s0 + $0x10] sm:$0xff]  ;;  %v145_v1 = vld [vmem:[%s440_s0 + $0xa0] sm:$0xff]  ;;  %v147_v2 = vld [vmem:[%s440_s0 + $0x28] sm:$0xff] }
   0x2   :  { %4 = vst [vmem:[%s441_s1] sm:$0xff] %v144_v0  ;;  %146 = vst [vmem:[%s441_s1 + $0x90] sm:$0xff] %v145_v1  ;;  %v149_v3 = vld [vmem:[%s440_s0 + $0xb8] sm:$0xff]  ;;  %v151_v4 = vld [vmem:[%s440_s0 + $0x40] sm:$0xff] }
   0x3   :  { %148 = vst [vmem:[%s441_s1 + $0x18] sm:$0xff] %v147_v2  ;;  %v153_v5 = vld [vmem:[%s440_s0 + $0xd0] sm:$0xff]  ;;  %150 = vst [vmem:[%s441_s1 + $0xa8] sm:$0xff] %v149_v3  ;;  %v155_v6 = vld [vmem:[%s440_s0 + $0x58] sm:$0xff] }
   0x4   :  { %152 = vst [vmem:[%s441_s1 + $0x30] sm:$0xff] %v151_v4  ;;  %154 = vst [vmem:[%s441_s1 + $0xc0] sm:$0xff] %v153_v5  ;;  %v157_v7 = vld [vmem:[%s440_s0 + $0xe8] sm:$0xff]  ;;  %v159_v8 = vld [vmem:[%s440_s0 + $0x70] sm:$0xff] }
   0x5   :  { %156 = vst [vmem:[%s441_s1 + $0x48] sm:$0xff] %v155_v6  ;;  %158 = vst [vmem:[%s441_s1 + $0xd8] sm:$0xff] %v157_v7  ;;  %v161_v9 = vld [vmem:[%s440_s0 + $0x100] sm:$0xff]  ;;  %v163_v10 = vld [vmem:[%s440_s0 + $0x88] sm:$0xff] }
   0x6   :  { %160 = vst [vmem:[%s441_s1 + $0x60] sm:$0xff] %v159_v8  ;;  %v165_v11 = vld [vmem:[%s440_s0 + $0x118] sm:$0xff]  ;;  %162 = vst [vmem:[%s441_s1 + $0xf0] sm:$0xff] %v161_v9  ;;  %v167_v12 = vld [vmem:[%s440_s0 + $0x8] sm:$0xff] }
   0x7   :  { %164 = vst [vmem:[%s441_s1 + $0x78] sm:$0xff] %v163_v10  ;;  %166 = vst [vmem:[%s441_s1 + $0x108] sm:$0xff] %v165_v11  ;;  %v169_v13 = vld [vmem:[%s440_s0 + $0x98] sm:$0xff]  ;;  %v171_v14 = vld [vmem:[%s440_s0 + $0x20] sm:$0xff] }
   0x8   :  { %168 = vst [vmem:[%s441_s1 + $0x8] sm:$0xff] %v167_v12  ;;  %170 = vst [vmem:[%s441_s1 + $0x98] sm:$0xff] %v169_v13  ;;  %v173_v15 = vld [vmem:[%s440_s0 + $0xb0] sm:$0xff]  ;;  %v175_v16 = vld [vmem:[%s440_s0 + $0x38] sm:$0xff] }
   0x9   :  { %172 = vst [vmem:[%s441_s1 + $0x20] sm:$0xff] %v171_v14  ;;  %v177_v17 = vld [vmem:[%s440_s0 + $0xc8] sm:$0xff]  ;;  %174 = vst [vmem:[%s441_s1 + $0xb0] sm:$0xff] %v173_v15  ;;  %v179_v18 = vld [vmem:[%s440_s0 + $0x50] sm:$0xff] }
   0xa   :  { %176 = vst [vmem:[%s441_s1 + $0x38] sm:$0xff] %v175_v16  ;;  %178 = vst [vmem:[%s441_s1 + $0xc8] sm:$0xff] %v177_v17  ;;  %v181_v19 = vld [vmem:[%s440_s0 + $0xe0] sm:$0xff]  ;;  %v183_v20 = vld [vmem:[%s440_s0 + $0x68] sm:$0xff] }
   0xb   :  { %180 = vst [vmem:[%s441_s1 + $0x50] sm:$0xff] %v179_v18  ;;  %182 = vst [vmem:[%s441_s1 + $0xe0] sm:$0xff] %v181_v19  ;;  %v185_v21 = vld [vmem:[%s440_s0 + $0xf8] sm:$0xff]  ;;  %v187_v22 = vld [vmem:[%s440_s0 + $0x80] sm:$0xff] }
   0xc   :  { %184 = vst [vmem:[%s441_s1 + $0x68] sm:$0xff] %v183_v20  ;;  %v189_v23 = vld [vmem:[%s440_s0 + $0x110] sm:$0xff]  ;;  %186 = vst [vmem:[%s441_s1 + $0xf8] sm:$0xff] %v185_v21  ;;  %v97_v24 = vld [vmem:[%s440_s0] sm:$0xff] }
   0xd   :  { %188 = vst [vmem:[%s441_s1 + $0x80] sm:$0xff] %v187_v22  ;;  %190 = vst [vmem:[%s441_s1 + $0x110] sm:$0xff] %v189_v23  ;;  %v192_v25 = vld [vmem:[%s440_s0 + $0x90] sm:$0xff]  ;;  %v194_v26 = vld [vmem:[%s440_s0 + $0x18] sm:$0xff] }
   0xe   :  { %191 = vst [vmem:[%s441_s1 + $0x10] sm:$0xff] %v97_v24  ;;  %193 = vst [vmem:[%s441_s1 + $0xa0] sm:$0xff] %v192_v25  ;;  %v196_v27 = vld [vmem:[%s440_s0 + $0xa8] sm:$0xff]  ;;  %v198_v28 = vld [vmem:[%s440_s0 + $0x30] sm:$0xff] }
   0xf   :  { %195 = vst [vmem:[%s441_s1 + $0x28] sm:$0xff] %v194_v26  ;;  %v200_v29 = vld [vmem:[%s440_s0 + $0xc0] sm:$0xff]  ;;  %197 = vst [vmem:[%s441_s1 + $0xb8] sm:$0xff] %v196_v27  ;;  %v202_v30 = vld [vmem:[%s440_s0 + $0x48] sm:$0xff] }
  0x10   :  { %199 = vst [vmem:[%s441_s1 + $0x40] sm:$0xff] %v198_v28  ;;  %201 = vst [vmem:[%s441_s1 + $0xd0] sm:$0xff] %v200_v29  ;;  %v204_v31 = vld [vmem:[%s440_s0 + $0xd8] sm:$0xff]  ;;  %v206_v32 = vld [vmem:[%s440_s0 + $0x60] sm:$0xff] }
  0x11   :  { %203 = vst [vmem:[%s441_s1 + $0x58] sm:$0xff] %v202_v30  ;;  %205 = vst [vmem:[%s441_s1 + $0xe8] sm:$0xff] %v204_v31  ;;  %v208_v33 = vld [vmem:[%s440_s0 + $0xf0] sm:$0xff]  ;;  %v210_v34 = vld [vmem:[%s440_s0 + $0x78] sm:$0xff] }
  0x12   :  { %207 = vst [vmem:[%s441_s1 + $0x70] sm:$0xff] %v206_v32  ;;  %v212_v35 = vld [vmem:[%s440_s0 + $0x108] sm:$0xff]  ;;  %209 = vst [vmem:[%s441_s1 + $0x100] sm:$0xff] %v208_v33 }
  0x13   :  { %211 = vst [vmem:[%s441_s1 + $0x88] sm:$0xff] %v210_v34  ;;  %213 = vst [vmem:[%s441_s1 + $0x118] sm:$0xff] %v212_v35 }

</bundles_post_ra>
